<compile_context>
chip_gen: v7x
topology: tpu7x:2x2x1
jax: 0.10.0
libtpu: 0.0.40
codegen_flags: <defaults>
</compile_context>

<pallas_src>
import functools

import jax
import jax.numpy as jnp
from jax.experimental import pallas as pl
from jax.experimental.pallas import tpu as pltpu


# ----------------------------- Pallas kernel -------------------------------

def _spectral_contract_kernel(x_ref, w_ref, o_ref):
    """Complex channel contraction for one corner group.

    Ref shapes (leading size-1 corner-group axis from the grid BlockSpec,
    real/imag packed on the next axis):
      x_ref : (1, 2, Cin, B,     L)
      w_ref : (1, 2, Cin, Cpad,  L)
      o_ref : (1, 2, B,   Cpad,  L)
    """
    cin = x_ref.shape[2]
    batch = x_ref.shape[3]
    cpad = w_ref.shape[3]
    lanes = w_ref.shape[4]

    # B*Cin is tiny here so a static unrolled loop with list accumulators is
    # fine (acc pressure: 2*B vregs-pairs).
    # TODO(synk): at production sizes (Cin=Cout=64, modes 16^3+) switch to
    # lax.fori_loop(..., unroll=small), tile Cout / lanes via extra grid axes
    # sized for v7x's 64 MiB VMEM, and cap the live accumulator at ~16-24 vregs.
    acc_r = [jnp.zeros((cpad, lanes), jnp.float32) for _ in range(batch)]
    acc_i = [jnp.zeros((cpad, lanes), jnp.float32) for _ in range(batch)]

    # Cin-outer / batch-inner: each (Cpad, L) weight tile is loaded once and
    # reused for every batch element.
    for i in range(cin):
        wr = w_ref[0, 0, i]          # (Cpad, L) contiguous tile
        wi = w_ref[0, 1, i]
        for b in range(batch):
            # Hoisted sublane broadcast of the x row, reused for both MAC pairs
            # (JAX does not CSE broadcast_in_dim).  A stride-0 pl.ds load is an
            # equivalent production option.
            xr = jnp.broadcast_to(x_ref[0, 0, i, b:b + 1, :], (cpad, lanes))
            xi = jnp.broadcast_to(x_ref[0, 1, i, b:b + 1, :], (cpad, lanes))
            # complex multiply-accumulate on the VPU
            acc_r[b] = acc_r[b] + xr * wr - xi * wi
            acc_i[b] = acc_i[b] + xr * wi + xi * wr

    for b in range(batch):
        o_ref[0, 0, b] = acc_r[b]
        o_ref[0, 1, b] = acc_i[b]


def spectral_corner_contract(x_packed, w_packed):
    """Run the Pallas contraction over corner groups.

    x_packed : f32 (G, 2, Cin, B,    L)
    w_packed : f32 (G, 2, Cin, Cpad, L)
    returns  : f32 (G, 2, B,   Cpad, L)
    """
    G, _, Cin, B, L = x_packed.shape
    Cpad = w_packed.shape[3]

    return pl.pallas_call(
        _spectral_contract_kernel,
        out_shape=jax.ShapeDtypeStruct((G, 2, B, Cpad, L), jnp.float32),
        grid=(G,),
        in_specs=[
            pl.BlockSpec((1, 2, Cin, B, L), lambda g: (g, 0, 0, 0, 0)),
            pl.BlockSpec((1, 2, Cin, Cpad, L), lambda g: (g, 0, 0, 0, 0)),
        ],
        out_specs=pl.BlockSpec((1, 2, B, Cpad, L), lambda g: (g, 0, 0, 0, 0)),
        compiler_params=pltpu.CompilerParams(
            dimension_semantics=("parallel",),
            vmem_limit_bytes=32 * 1024 * 1024),
    )(x_packed, w_packed)


# ------------------------- one-time weight preparation ----------------------

def _default_corner_groups():
    """2 corner groups (one per TensorCore) on v7x, 1 elsewhere."""
    try:
        kind = jax.devices()[0].device_kind.lower()
        if "v7" in kind:
            return 2
    except Exception:
        pass
    return 1


def prepare_spectral_weights(weights, num_corner_groups=1):
    """One-time re-layout of the 4 corner weights into the kernel layout.

    weights : complex64 (4, Cin, Cout, hm_h, hm_w, hm_d)
    returns : float32   (G, 2, Cin, Cpad, L)   with L = (4//G)*hm_h*hm_w*hm_d,
              Cpad = Cout rounded up to a multiple of 8.
    Done once at parameter load; reused by every forward call.
    """
    ncorner, Cin, Cout, mh, mw, md = weights.shape
    G = num_corner_groups
    assert ncorner % G == 0, (ncorner, G)
    P = ncorner // G
    M = mh * mw * md
    L = P * M
    Cpad = ((Cout + 7) // 8) * 8

    wf = weights.reshape(G, P, Cin, Cout, M)
    wf = wf.transpose(0, 2, 3, 1, 4).reshape(G, Cin, Cout, L)
    w_packed = jnp.stack(
        [jnp.real(wf).astype(jnp.float32), jnp.imag(wf).astype(jnp.float32)],
        axis=1)                                   # (G, 2, Cin, Cout, L)
    if Cpad != Cout:
        w_packed = jnp.pad(
            w_packed, ((0, 0), (0, 0), (0, 0), (0, Cpad - Cout), (0, 0)))
    # TODO(synk): on v6e/v7x the packed weights could be stored in bf16
    # (f32 accumulation in-kernel) to halve weight HBM/VMEM traffic.
    return jax.device_put(w_packed)


# --------------------------- Module forward (glue) --------------------------

def factorized_spectral_conv3d_forward(x, w_packed, bias, *,
                                       out_channels, half_modes,
                                       fft_norm="backward"):
    """Forward of FactorizedSpectralConv3d (dense / reconstructed weights).

    x        : float32 (B, Cin, H, W, D)
    w_packed : float32 (G, 2, Cin, Cpad, L) from prepare_spectral_weights
    bias     : float32 (Cout, 1, 1, 1) or None
    """
    B, Cin, H, W, D = x.shape
    hm_h, hm_w, hm_d = half_modes
    Cout = out_channels
    Dr = D // 2 + 1

    G = w_packed.shape[0]
    P = 4 // G
    M = hm_h * hm_w * hm_d
    L = P * M

    # TODO(synk): rfftn/irfftn have no Pallas TPU equivalent; they stay in XLA.
    xf = jnp.fft.rfftn(x.astype(jnp.float32), axes=(-3, -2, -1), norm=fft_norm)

    # Corner gather -> kernel layout in one fused producer:
    # slice each corner, go channel-major (Cin, B, M), fold corners of a group
    # into the lane axis, pack real/imag on a leading axis.
    corners = (
        xf[:, :, :hm_h, :hm_w, :hm_d],
        xf[:, :, :hm_h, -hm_w:, :hm_d],
        xf[:, :, -hm_h:, :hm_w, :hm_d],
        xf[:, :, -hm_h:, -hm_w:, :hm_d],
    )
    groups = []
    for g in range(G):
        parts = [corners[g * P + p].reshape(B, Cin, M).transpose(1, 0, 2)
                 for p in range(P)]
        groups.append(jnp.concatenate(parts, axis=-1))     # (Cin, B, L)
    xg = jnp.stack(groups, axis=0)                          # (G, Cin, B, L)
    x_packed = jnp.stack(
        [jnp.real(xg), jnp.imag(xg)], axis=1).astype(jnp.float32)

    # ---- Pallas contraction ----
    o_packed = spectral_corner_contract(x_packed, w_packed)  # (G,2,B,Cpad,L)

    o = jax.lax.complex(o_packed[:, 0], o_packed[:, 1])      # (G, B, Cpad, L)
    o = o[:, :, :Cout, :]                                    # strip Cout pad
    o = o.reshape(G, B, Cout, P, M).transpose(0, 3, 1, 2, 4)
    out_corners = o.reshape(4, B, Cout, hm_h, hm_w, hm_d)
    o0, o1, o2, o3 = (out_corners[0], out_corners[1],
                      out_corners[2], out_corners[3])

    if H >= 2 * hm_h and W >= 2 * hm_w and hm_d <= Dr:
        # Assemble out_fft with concats/pads -> one fused write instead of a
        # zeros buffer plus four full-buffer dynamic-update-slices.
        zw = jnp.zeros((B, Cout, hm_h, W - 2 * hm_w, hm_d), jnp.complex64)
        top = jnp.concatenate([o0, zw, o1], axis=3)
        bot = jnp.concatenate([o2, zw, o3], axis=3)
        zh = jnp.zeros((B, Cout, H - 2 * hm_h, W, hm_d), jnp.complex64)
        hw = jnp.concatenate([top, zh, bot], axis=2)
        zd = jnp.zeros((B, Cout, H, W, Dr - hm_d), jnp.complex64)
        out_fft = jnp.concatenate([hw, zd], axis=4)
    else:
        # Overlapping corner windows: scatter path reproduces the PyTorch
        # "later writes win" semantics.
        out_fft = jnp.zeros((B, Cout, H, W, Dr), dtype=jnp.complex64)
        out_fft = out_fft.at[:, :, :hm_h, :hm_w, :hm_d].set(o0)
        out_fft = out_fft.at[:, :, :hm_h, -hm_w:, :hm_d].set(o1)
        out_fft = out_fft.at[:, :, -hm_h:, :hm_w, :hm_d].set(o2)
        out_fft = out_fft.at[:, :, -hm_h:, -hm_w:, :hm_d].set(o3)

    out = jnp.fft.irfftn(out_fft, s=(H, W, D), axes=(-3, -2, -1), norm=fft_norm)

    if bias is not None:
        out = out + bias  # (Cout,1,1,1) broadcasts over (B, Cout, H, W, D)
    return out


# ------------------------------ reference (JAX) -----------------------------

def _reference_forward(x, weights, bias, half_modes, fft_norm="backward"):
    B, Cin, H, W, D = x.shape
    hm_h, hm_w, hm_d = half_modes
    Cout = weights.shape[2]
    xf = jnp.fft.rfftn(x.astype(jnp.float32), axes=(-3, -2, -1), norm=fft_norm)
    out_fft = jnp.zeros((B, Cout, H, W, D // 2 + 1), dtype=jnp.complex64)

    def contract(xs, w):
        return jnp.einsum("bixyz,ioxyz->boxyz", xs, w)

    out_fft = out_fft.at[:, :, :hm_h, :hm_w, :hm_d].set(
        contract(xf[:, :, :hm_h, :hm_w, :hm_d], weights[0]))
    out_fft = out_fft.at[:, :, :hm_h, -hm_w:, :hm_d].set(
        contract(xf[:, :, :hm_h, -hm_w:, :hm_d], weights[1]))
    out_fft = out_fft.at[:, :, -hm_h:, :hm_w, :hm_d].set(
        contract(xf[:, :, -hm_h:, :hm_w, :hm_d], weights[2]))
    out_fft = out_fft.at[:, :, -hm_h:, -hm_w:, :hm_d].set(
        contract(xf[:, :, -hm_h:, -hm_w:, :hm_d], weights[3]))

    out = jnp.fft.irfftn(out_fft, s=(H, W, D), axes=(-3, -2, -1), norm=fft_norm)
    if bias is not None:
        out = out + bias
    return out


# ---------------------------------- main ------------------------------------

if __name__ == "__main__":
    # Module config (small, consistent with the PyTorch __init__):
    in_channels, out_channels = 4, 6
    modes_height = modes_width = modes_depth = 8
    half_modes = (modes_height // 2, modes_width // 2, modes_depth // 2)  # (4,4,4)
    n_layers = 1
    scale = 1.0 / (in_channels * out_channels)        # scale='auto'
    fft_norm = "backward"

    B, H, W, D = 2, 16, 16, 16

    key = jax.random.PRNGKey(0)
    k_x, k_wr, k_wi, k_b = jax.random.split(key, 4)

    # Deterministic parameter init (dense complex weights ~ Normal(0, scale),
    # one weight per Fourier corner: 2**(order-1) * n_layers = 4 weights).
    w_shape = (4, in_channels, out_channels, *half_modes)
    w_real = scale * jax.random.normal(k_wr, w_shape, dtype=jnp.float32)
    w_imag = scale * jax.random.normal(k_wi, w_shape, dtype=jnp.float32)
    weights = w_real.astype(jnp.complex64) + 1j * w_imag.astype(jnp.complex64)

    # bias: (n_layers, out_channels, 1, 1, 1); use layer index 0.
    bias_full = scale * jax.random.normal(
        k_b, (n_layers, out_channels, 1, 1, 1), dtype=jnp.float32)
    bias = bias_full[0]

    x = jax.random.normal(k_x, (B, in_channels, H, W, D), dtype=jnp.float32)

    # One-time weight layout (cached across forward calls).
    G = _default_corner_groups()
    w_packed = prepare_spectral_weights(weights, num_corner_groups=G)

    forward = jax.jit(
        factorized_spectral_conv3d_forward,
        static_argnames=("out_channels", "half_modes", "fft_norm"))

    out = forward(x, w_packed, bias, out_channels=out_channels,
                  half_modes=half_modes, fft_norm=fft_norm)
    out = jax.block_until_ready(out)

    ref = jax.block_until_ready(
        _reference_forward(x, weights, bias, half_modes, fft_norm=fft_norm))

    assert out.shape == (B, out_channels, H, W, D), out.shape
    assert out.dtype == jnp.float32, out.dtype
    assert jnp.allclose(out, ref, rtol=1e-4, atol=1e-5), "mismatch vs reference"

    print("KERNEL_OK")
</pallas_src>

<mosaic_0001>
module attributes {stable_mosaic.version = 11 : i64} {
  func.func @_spectral_contract_kernel(%arg0: i32, %arg1: memref<1x2x4x2x256xf32, #tpu.memory_space<vmem>>, %arg2: memref<1x2x4x8x256xf32, #tpu.memory_space<vmem>>, %arg3: memref<1x2x2x8x256xf32, #tpu.memory_space<vmem>>) attributes {dimension_semantics = [#tpu.dimension_semantics<parallel>], iteration_bounds = array<i64: 1>, scalar_prefetch = 0 : i64, scratch_operands = 0 : i64, tpu.core_type = #tpu.core_type<tc>, window_params = [{transform_indices = @transform_0, window_bounds = array<i64: 1, 2, 4, 2, 256>}, {transform_indices = @transform_1, window_bounds = array<i64: 1, 2, 4, 8, 256>}, {transform_indices = @transform_2, window_bounds = array<i64: 1, 2, 2, 8, 256>}]} {
    %cst = arith.constant 0.000000e+00 : f32
    %0 = vector.broadcast %cst : f32 to vector<8x256xf32>
    %cst_0 = arith.constant 0.000000e+00 : f32
    %1 = vector.broadcast %cst_0 : f32 to vector<8x256xf32>
    %cst_1 = arith.constant 0.000000e+00 : f32
    %2 = vector.broadcast %cst_1 : f32 to vector<8x256xf32>
    %cst_2 = arith.constant 0.000000e+00 : f32
    %3 = vector.broadcast %cst_2 : f32 to vector<8x256xf32>
    %c0 = arith.constant 0 : index
    %c0_3 = arith.constant 0 : index
    %c0_4 = arith.constant 0 : index
    %c0_5 = arith.constant 0 : index
    %c0_6 = arith.constant 0 : index
    %4 = vector.load %arg2[%c0, %c0_3, %c0_4, %c0_5, %c0_6] : memref<1x2x4x8x256xf32, #tpu.memory_space<vmem>>, vector<1x1x1x8x256xf32>
    %5 = vector.shape_cast %4 : vector<1x1x1x8x256xf32> to vector<8x256xf32>
    %c0_7 = arith.constant 0 : index
    %c1 = arith.constant 1 : index
    %c0_8 = arith.constant 0 : index
    %c0_9 = arith.constant 0 : index
    %c0_10 = arith.constant 0 : index
    %6 = vector.load %arg2[%c0_7, %c1, %c0_8, %c0_9, %c0_10] : memref<1x2x4x8x256xf32, #tpu.memory_space<vmem>>, vector<1x1x1x8x256xf32>
    %7 = vector.shape_cast %6 : vector<1x1x1x8x256xf32> to vector<8x256xf32>
    %c0_11 = arith.constant 0 : index
    %c0_12 = arith.constant 0 : index
    %c0_13 = arith.constant 0 : index
    %c0_14 = arith.constant 0 : index
    %c0_15 = arith.constant 0 : index
    %8 = vector.load %arg1[%c0_11, %c0_12, %c0_13, %c0_14, %c0_15] : memref<1x2x4x2x256xf32, #tpu.memory_space<vmem>>, vector<1x1x1x1x256xf32>
    %9 = vector.shape_cast %8 : vector<1x1x1x1x256xf32> to vector<1x256xf32>
    %10 = vector.shape_cast %9 : vector<1x256xf32> to vector<1x256xf32>
    %11 = vector.broadcast %10 : vector<1x256xf32> to vector<8x256xf32>
    %c0_16 = arith.constant 0 : index
    %c1_17 = arith.constant 1 : index
    %c0_18 = arith.constant 0 : index
    %c0_19 = arith.constant 0 : index
    %c0_20 = arith.constant 0 : index
    %12 = vector.load %arg1[%c0_16, %c1_17, %c0_18, %c0_19, %c0_20] : memref<1x2x4x2x256xf32, #tpu.memory_space<vmem>>, vector<1x1x1x1x256xf32>
    %13 = vector.shape_cast %12 : vector<1x1x1x1x256xf32> to vector<1x256xf32>
    %14 = vector.shape_cast %13 : vector<1x256xf32> to vector<1x256xf32>
    %15 = vector.broadcast %14 : vector<1x256xf32> to vector<8x256xf32>
    %16 = arith.mulf %11, %5 : vector<8x256xf32>
    %17 = arith.addf %0, %16 : vector<8x256xf32>
    %18 = arith.mulf %15, %7 : vector<8x256xf32>
    %19 = arith.subf %17, %18 : vector<8x256xf32>
    %20 = arith.mulf %11, %7 : vector<8x256xf32>
    %21 = arith.addf %2, %20 : vector<8x256xf32>
    %22 = arith.mulf %15, %5 : vector<8x256xf32>
    %23 = arith.addf %21, %22 : vector<8x256xf32>
    %c0_21 = arith.constant 0 : index
    %c0_22 = arith.constant 0 : index
    %c0_23 = arith.constant 0 : index
    %c1_24 = arith.constant 1 : index
    %c0_25 = arith.constant 0 : index
    %24 = vector.load %arg1[%c0_21, %c0_22, %c0_23, %c1_24, %c0_25] : memref<1x2x4x2x256xf32, #tpu.memory_space<vmem>>, vector<1x1x1x1x256xf32>
    %25 = vector.shape_cast %24 : vector<1x1x1x1x256xf32> to vector<1x256xf32>
    %26 = vector.shape_cast %25 : vector<1x256xf32> to vector<1x256xf32>
    %27 = vector.broadcast %26 : vector<1x256xf32> to vector<8x256xf32>
    %c0_26 = arith.constant 0 : index
    %c1_27 = arith.constant 1 : index
    %c0_28 = arith.constant 0 : index
    %c1_29 = arith.constant 1 : index
    %c0_30 = arith.constant 0 : index
    %28 = vector.load %arg1[%c0_26, %c1_27, %c0_28, %c1_29, %c0_30] : memref<1x2x4x2x256xf32, #tpu.memory_space<vmem>>, vector<1x1x1x1x256xf32>
    %29 = vector.shape_cast %28 : vector<1x1x1x1x256xf32> to vector<1x256xf32>
    %30 = vector.shape_cast %29 : vector<1x256xf32> to vector<1x256xf32>
    %31 = vector.broadcast %30 : vector<1x256xf32> to vector<8x256xf32>
    %32 = arith.mulf %27, %5 : vector<8x256xf32>
    %33 = arith.addf %1, %32 : vector<8x256xf32>
    %34 = arith.mulf %31, %7 : vector<8x256xf32>
    %35 = arith.subf %33, %34 : vector<8x256xf32>
    %36 = arith.mulf %27, %7 : vector<8x256xf32>
    %37 = arith.addf %3, %36 : vector<8x256xf32>
    %38 = arith.mulf %31, %5 : vector<8x256xf32>
    %39 = arith.addf %37, %38 : vector<8x256xf32>
    %c0_31 = arith.constant 0 : index
    %c0_32 = arith.constant 0 : index
    %c1_33 = arith.constant 1 : index
    %c0_34 = arith.constant 0 : index
    %c0_35 = arith.constant 0 : index
    %40 = vector.load %arg2[%c0_31, %c0_32, %c1_33, %c0_34, %c0_35] : memref<1x2x4x8x256xf32, #tpu.memory_space<vmem>>, vector<1x1x1x8x256xf32>
    %41 = vector.shape_cast %40 : vector<1x1x1x8x256xf32> to vector<8x256xf32>
    %c0_36 = arith.constant 0 : index
    %c1_37 = arith.constant 1 : index
    %c1_38 = arith.constant 1 : index
    %c0_39 = arith.constant 0 : index
    %c0_40 = arith.constant 0 : index
    %42 = vector.load %arg2[%c0_36, %c1_37, %c1_38, %c0_39, %c0_40] : memref<1x2x4x8x256xf32, #tpu.memory_space<vmem>>, vector<1x1x1x8x256xf32>
    %43 = vector.shape_cast %42 : vector<1x1x1x8x256xf32> to vector<8x256xf32>
    %c0_41 = arith.constant 0 : index
    %c0_42 = arith.constant 0 : index
    %c1_43 = arith.constant 1 : index
    %c0_44 = arith.constant 0 : index
    %c0_45 = arith.constant 0 : index
    %44 = vector.load %arg1[%c0_41, %c0_42, %c1_43, %c0_44, %c0_45] : memref<1x2x4x2x256xf32, #tpu.memory_space<vmem>>, vector<1x1x1x1x256xf32>
    %45 = vector.shape_cast %44 : vector<1x1x1x1x256xf32> to vector<1x256xf32>
    %46 = vector.shape_cast %45 : vector<1x256xf32> to vector<1x256xf32>
    %47 = vector.broadcast %46 : vector<1x256xf32> to vector<8x256xf32>
    %c0_46 = arith.constant 0 : index
    %c1_47 = arith.constant 1 : index
    %c1_48 = arith.constant 1 : index
    %c0_49 = arith.constant 0 : index
    %c0_50 = arith.constant 0 : index
    %48 = vector.load %arg1[%c0_46, %c1_47, %c1_48, %c0_49, %c0_50] : memref<1x2x4x2x256xf32, #tpu.memory_space<vmem>>, vector<1x1x1x1x256xf32>
    %49 = vector.shape_cast %48 : vector<1x1x1x1x256xf32> to vector<1x256xf32>
    %50 = vector.shape_cast %49 : vector<1x256xf32> to vector<1x256xf32>
    %51 = vector.broadcast %50 : vector<1x256xf32> to vector<8x256xf32>
    %52 = arith.mulf %47, %41 : vector<8x256xf32>
    %53 = arith.addf %19, %52 : vector<8x256xf32>
    %54 = arith.mulf %51, %43 : vector<8x256xf32>
    %55 = arith.subf %53, %54 : vector<8x256xf32>
    %56 = arith.mulf %47, %43 : vector<8x256xf32>
    %57 = arith.addf %23, %56 : vector<8x256xf32>
    %58 = arith.mulf %51, %41 : vector<8x256xf32>
    %59 = arith.addf %57, %58 : vector<8x256xf32>
    %c0_51 = arith.constant 0 : index
    %c0_52 = arith.constant 0 : index
    %c1_53 = arith.constant 1 : index
    %c1_54 = arith.constant 1 : index
    %c0_55 = arith.constant 0 : index
    %60 = vector.load %arg1[%c0_51, %c0_52, %c1_53, %c1_54, %c0_55] : memref<1x2x4x2x256xf32, #tpu.memory_space<vmem>>, vector<1x1x1x1x256xf32>
    %61 = vector.shape_cast %60 : vector<1x1x1x1x256xf32> to vector<1x256xf32>
    %62 = vector.shape_cast %61 : vector<1x256xf32> to vector<1x256xf32>
    %63 = vector.broadcast %62 : vector<1x256xf32> to vector<8x256xf32>
    %c0_56 = arith.constant 0 : index
    %c1_57 = arith.constant 1 : index
    %c1_58 = arith.constant 1 : index
    %c1_59 = arith.constant 1 : index
    %c0_60 = arith.constant 0 : index
    %64 = vector.load %arg1[%c0_56, %c1_57, %c1_58, %c1_59, %c0_60] : memref<1x2x4x2x256xf32, #tpu.memory_space<vmem>>, vector<1x1x1x1x256xf32>
    %65 = vector.shape_cast %64 : vector<1x1x1x1x256xf32> to vector<1x256xf32>
    %66 = vector.shape_cast %65 : vector<1x256xf32> to vector<1x256xf32>
    %67 = vector.broadcast %66 : vector<1x256xf32> to vector<8x256xf32>
    %68 = arith.mulf %63, %41 : vector<8x256xf32>
    %69 = arith.addf %35, %68 : vector<8x256xf32>
    %70 = arith.mulf %67, %43 : vector<8x256xf32>
    %71 = arith.subf %69, %70 : vector<8x256xf32>
    %72 = arith.mulf %63, %43 : vector<8x256xf32>
    %73 = arith.addf %39, %72 : vector<8x256xf32>
    %74 = arith.mulf %67, %41 : vector<8x256xf32>
    %75 = arith.addf %73, %74 : vector<8x256xf32>
    %c0_61 = arith.constant 0 : index
    %c0_62 = arith.constant 0 : index
    %c2 = arith.constant 2 : index
    %c0_63 = arith.constant 0 : index
    %c0_64 = arith.constant 0 : index
    %76 = vector.load %arg2[%c0_61, %c0_62, %c2, %c0_63, %c0_64] : memref<1x2x4x8x256xf32, #tpu.memory_space<vmem>>, vector<1x1x1x8x256xf32>
    %77 = vector.shape_cast %76 : vector<1x1x1x8x256xf32> to vector<8x256xf32>
    %c0_65 = arith.constant 0 : index
    %c1_66 = arith.constant 1 : index
    %c2_67 = arith.constant 2 : index
    %c0_68 = arith.constant 0 : index
    %c0_69 = arith.constant 0 : index
    %78 = vector.load %arg2[%c0_65, %c1_66, %c2_67, %c0_68, %c0_69] : memref<1x2x4x8x256xf32, #tpu.memory_space<vmem>>, vector<1x1x1x8x256xf32>
    %79 = vector.shape_cast %78 : vector<1x1x1x8x256xf32> to vector<8x256xf32>
    %c0_70 = arith.constant 0 : index
    %c0_71 = arith.constant 0 : index
    %c2_72 = arith.constant 2 : index
    %c0_73 = arith.constant 0 : index
    %c0_74 = arith.constant 0 : index
    %80 = vector.load %arg1[%c0_70, %c0_71, %c2_72, %c0_73, %c0_74] : memref<1x2x4x2x256xf32, #tpu.memory_space<vmem>>, vector<1x1x1x1x256xf32>
    %81 = vector.shape_cast %80 : vector<1x1x1x1x256xf32> to vector<1x256xf32>
    %82 = vector.shape_cast %81 : vector<1x256xf32> to vector<1x256xf32>
    %83 = vector.broadcast %82 : vector<1x256xf32> to vector<8x256xf32>
    %c0_75 = arith.constant 0 : index
    %c1_76 = arith.constant 1 : index
    %c2_77 = arith.constant 2 : index
    %c0_78 = arith.constant 0 : index
    %c0_79 = arith.constant 0 : index
    %84 = vector.load %arg1[%c0_75, %c1_76, %c2_77, %c0_78, %c0_79] : memref<1x2x4x2x256xf32, #tpu.memory_space<vmem>>, vector<1x1x1x1x256xf32>
    %85 = vector.shape_cast %84 : vector<1x1x1x1x256xf32> to vector<1x256xf32>
    %86 = vector.shape_cast %85 : vector<1x256xf32> to vector<1x256xf32>
    %87 = vector.broadcast %86 : vector<1x256xf32> to vector<8x256xf32>
    %88 = arith.mulf %83, %77 : vector<8x256xf32>
    %89 = arith.addf %55, %88 : vector<8x256xf32>
    %90 = arith.mulf %87, %79 : vector<8x256xf32>
    %91 = arith.subf %89, %90 : vector<8x256xf32>
    %92 = arith.mulf %83, %79 : vector<8x256xf32>
    %93 = arith.addf %59, %92 : vector<8x256xf32>
    %94 = arith.mulf %87, %77 : vector<8x256xf32>
    %95 = arith.addf %93, %94 : vector<8x256xf32>
    %c0_80 = arith.constant 0 : index
    %c0_81 = arith.constant 0 : index
    %c2_82 = arith.constant 2 : index
    %c1_83 = arith.constant 1 : index
    %c0_84 = arith.constant 0 : index
    %96 = vector.load %arg1[%c0_80, %c0_81, %c2_82, %c1_83, %c0_84] : memref<1x2x4x2x256xf32, #tpu.memory_space<vmem>>, vector<1x1x1x1x256xf32>
    %97 = vector.shape_cast %96 : vector<1x1x1x1x256xf32> to vector<1x256xf32>
    %98 = vector.shape_cast %97 : vector<1x256xf32> to vector<1x256xf32>
    %99 = vector.broadcast %98 : vector<1x256xf32> to vector<8x256xf32>
    %c0_85 = arith.constant 0 : index
    %c1_86 = arith.constant 1 : index
    %c2_87 = arith.constant 2 : index
    %c1_88 = arith.constant 1 : index
    %c0_89 = arith.constant 0 : index
    %100 = vector.load %arg1[%c0_85, %c1_86, %c2_87, %c1_88, %c0_89] : memref<1x2x4x2x256xf32, #tpu.memory_space<vmem>>, vector<1x1x1x1x256xf32>
    %101 = vector.shape_cast %100 : vector<1x1x1x1x256xf32> to vector<1x256xf32>
    %102 = vector.shape_cast %101 : vector<1x256xf32> to vector<1x256xf32>
    %103 = vector.broadcast %102 : vector<1x256xf32> to vector<8x256xf32>
    %104 = arith.mulf %99, %77 : vector<8x256xf32>
    %105 = arith.addf %71, %104 : vector<8x256xf32>
    %106 = arith.mulf %103, %79 : vector<8x256xf32>
    %107 = arith.subf %105, %106 : vector<8x256xf32>
    %108 = arith.mulf %99, %79 : vector<8x256xf32>
    %109 = arith.addf %75, %108 : vector<8x256xf32>
    %110 = arith.mulf %103, %77 : vector<8x256xf32>
    %111 = arith.addf %109, %110 : vector<8x256xf32>
    %c0_90 = arith.constant 0 : index
    %c0_91 = arith.constant 0 : index
    %c3 = arith.constant 3 : index
    %c0_92 = arith.constant 0 : index
    %c0_93 = arith.constant 0 : index
    %112 = vector.load %arg2[%c0_90, %c0_91, %c3, %c0_92, %c0_93] : memref<1x2x4x8x256xf32, #tpu.memory_space<vmem>>, vector<1x1x1x8x256xf32>
    %113 = vector.shape_cast %112 : vector<1x1x1x8x256xf32> to vector<8x256xf32>
    %c0_94 = arith.constant 0 : index
    %c1_95 = arith.constant 1 : index
    %c3_96 = arith.constant 3 : index
    %c0_97 = arith.constant 0 : index
    %c0_98 = arith.constant 0 : index
    %114 = vector.load %arg2[%c0_94, %c1_95, %c3_96, %c0_97, %c0_98] : memref<1x2x4x8x256xf32, #tpu.memory_space<vmem>>, vector<1x1x1x8x256xf32>
    %115 = vector.shape_cast %114 : vector<1x1x1x8x256xf32> to vector<8x256xf32>
    %c0_99 = arith.constant 0 : index
    %c0_100 = arith.constant 0 : index
    %c3_101 = arith.constant 3 : index
    %c0_102 = arith.constant 0 : index
    %c0_103 = arith.constant 0 : index
    %116 = vector.load %arg1[%c0_99, %c0_100, %c3_101, %c0_102, %c0_103] : memref<1x2x4x2x256xf32, #tpu.memory_space<vmem>>, vector<1x1x1x1x256xf32>
    %117 = vector.shape_cast %116 : vector<1x1x1x1x256xf32> to vector<1x256xf32>
    %118 = vector.shape_cast %117 : vector<1x256xf32> to vector<1x256xf32>
    %119 = vector.broadcast %118 : vector<1x256xf32> to vector<8x256xf32>
    %c0_104 = arith.constant 0 : index
    %c1_105 = arith.constant 1 : index
    %c3_106 = arith.constant 3 : index
    %c0_107 = arith.constant 0 : index
    %c0_108 = arith.constant 0 : index
    %120 = vector.load %arg1[%c0_104, %c1_105, %c3_106, %c0_107, %c0_108] : memref<1x2x4x2x256xf32, #tpu.memory_space<vmem>>, vector<1x1x1x1x256xf32>
    %121 = vector.shape_cast %120 : vector<1x1x1x1x256xf32> to vector<1x256xf32>
    %122 = vector.shape_cast %121 : vector<1x256xf32> to vector<1x256xf32>
    %123 = vector.broadcast %122 : vector<1x256xf32> to vector<8x256xf32>
    %124 = arith.mulf %119, %113 : vector<8x256xf32>
    %125 = arith.addf %91, %124 : vector<8x256xf32>
    %126 = arith.mulf %123, %115 : vector<8x256xf32>
    %127 = arith.subf %125, %126 : vector<8x256xf32>
    %128 = arith.mulf %119, %115 : vector<8x256xf32>
    %129 = arith.addf %95, %128 : vector<8x256xf32>
    %130 = arith.mulf %123, %113 : vector<8x256xf32>
    %131 = arith.addf %129, %130 : vector<8x256xf32>
    %c0_109 = arith.constant 0 : index
    %c0_110 = arith.constant 0 : index
    %c3_111 = arith.constant 3 : index
    %c1_112 = arith.constant 1 : index
    %c0_113 = arith.constant 0 : index
    %132 = vector.load %arg1[%c0_109, %c0_110, %c3_111, %c1_112, %c0_113] : memref<1x2x4x2x256xf32, #tpu.memory_space<vmem>>, vector<1x1x1x1x256xf32>
    %133 = vector.shape_cast %132 : vector<1x1x1x1x256xf32> to vector<1x256xf32>
    %134 = vector.shape_cast %133 : vector<1x256xf32> to vector<1x256xf32>
    %135 = vector.broadcast %134 : vector<1x256xf32> to vector<8x256xf32>
    %c0_114 = arith.constant 0 : index
    %c1_115 = arith.constant 1 : index
    %c3_116 = arith.constant 3 : index
    %c1_117 = arith.constant 1 : index
    %c0_118 = arith.constant 0 : index
    %136 = vector.load %arg1[%c0_114, %c1_115, %c3_116, %c1_117, %c0_118] : memref<1x2x4x2x256xf32, #tpu.memory_space<vmem>>, vector<1x1x1x1x256xf32>
    %137 = vector.shape_cast %136 : vector<1x1x1x1x256xf32> to vector<1x256xf32>
    %138 = vector.shape_cast %137 : vector<1x256xf32> to vector<1x256xf32>
    %139 = vector.broadcast %138 : vector<1x256xf32> to vector<8x256xf32>
    %140 = arith.mulf %135, %113 : vector<8x256xf32>
    %141 = arith.addf %107, %140 : vector<8x256xf32>
    %142 = arith.mulf %139, %115 : vector<8x256xf32>
    %143 = arith.subf %141, %142 : vector<8x256xf32>
    %144 = arith.mulf %135, %115 : vector<8x256xf32>
    %145 = arith.addf %111, %144 : vector<8x256xf32>
    %146 = arith.mulf %139, %113 : vector<8x256xf32>
    %147 = arith.addf %145, %146 : vector<8x256xf32>
    %c0_119 = arith.constant 0 : index
    %c0_120 = arith.constant 0 : index
    %c0_121 = arith.constant 0 : index
    %c0_122 = arith.constant 0 : index
    %c0_123 = arith.constant 0 : index
    %148 = vector.load %arg3[%c0_119, %c0_120, %c0_121, %c0_122, %c0_123] : memref<1x2x2x8x256xf32, #tpu.memory_space<vmem>>, vector<1x1x1x8x256xf32>
    %149 = vector.shape_cast %148 : vector<1x1x1x8x256xf32> to vector<8x256xf32>
    %150 = vector.shape_cast %127 : vector<8x256xf32> to vector<1x1x1x8x256xf32>
    tpu.vector_store %arg3[%c0_119, %c0_120, %c0_121, %c0_122, %c0_123], %150 {strides = array<i32>} : memref<1x2x2x8x256xf32, #tpu.memory_space<vmem>>, vector<1x1x1x8x256xf32>,
    %c0_124 = arith.constant 0 : index
    %c1_125 = arith.constant 1 : index
    %c0_126 = arith.constant 0 : index
    %c0_127 = arith.constant 0 : index
    %c0_128 = arith.constant 0 : index
    %151 = vector.load %arg3[%c0_124, %c1_125, %c0_126, %c0_127, %c0_128] : memref<1x2x2x8x256xf32, #tpu.memory_space<vmem>>, vector<1x1x1x8x256xf32>
    %152 = vector.shape_cast %151 : vector<1x1x1x8x256xf32> to vector<8x256xf32>
    %153 = vector.shape_cast %131 : vector<8x256xf32> to vector<1x1x1x8x256xf32>
    tpu.vector_store %arg3[%c0_124, %c1_125, %c0_126, %c0_127, %c0_128], %153 {strides = array<i32>} : memref<1x2x2x8x256xf32, #tpu.memory_space<vmem>>, vector<1x1x1x8x256xf32>,
    %c0_129 = arith.constant 0 : index
    %c0_130 = arith.constant 0 : index
    %c1_131 = arith.constant 1 : index
    %c0_132 = arith.constant 0 : index
    %c0_133 = arith.constant 0 : index
    %154 = vector.load %arg3[%c0_129, %c0_130, %c1_131, %c0_132, %c0_133] : memref<1x2x2x8x256xf32, #tpu.memory_space<vmem>>, vector<1x1x1x8x256xf32>
    %155 = vector.shape_cast %154 : vector<1x1x1x8x256xf32> to vector<8x256xf32>
    %156 = vector.shape_cast %143 : vector<8x256xf32> to vector<1x1x1x8x256xf32>
    tpu.vector_store %arg3[%c0_129, %c0_130, %c1_131, %c0_132, %c0_133], %156 {strides = array<i32>} : memref<1x2x2x8x256xf32, #tpu.memory_space<vmem>>, vector<1x1x1x8x256xf32>,
    %c0_134 = arith.constant 0 : index
    %c1_135 = arith.constant 1 : index
    %c1_136 = arith.constant 1 : index
    %c0_137 = arith.constant 0 : index
    %c0_138 = arith.constant 0 : index
    %157 = vector.load %arg3[%c0_134, %c1_135, %c1_136, %c0_137, %c0_138] : memref<1x2x2x8x256xf32, #tpu.memory_space<vmem>>, vector<1x1x1x8x256xf32>
    %158 = vector.shape_cast %157 : vector<1x1x1x8x256xf32> to vector<8x256xf32>
    %159 = vector.shape_cast %147 : vector<8x256xf32> to vector<1x1x1x8x256xf32>
    tpu.vector_store %arg3[%c0_134, %c1_135, %c1_136, %c0_137, %c0_138], %159 {strides = array<i32>} : memref<1x2x2x8x256xf32, #tpu.memory_space<vmem>>, vector<1x1x1x8x256xf32>,
    return
  }
  func.func @transform_0(%arg0: i32) -> (i32, i32, i32, i32, i32) {
    %c0_i32 = arith.constant 0 : i32
    %c0_i32_0 = arith.constant 0 : i32
    %c0_i32_1 = arith.constant 0 : i32
    %c0_i32_2 = arith.constant 0 : i32
    %c0_i32_3 = arith.constant 0 : i32
    return %arg0, %c0_i32, %c0_i32_0, %c0_i32_1, %c0_i32_2 : i32, i32, i32, i32, i32
  }
  func.func @transform_1(%arg0: i32) -> (i32, i32, i32, i32, i32) {
    %c0_i32 = arith.constant 0 : i32
    %c0_i32_0 = arith.constant 0 : i32
    %c0_i32_1 = arith.constant 0 : i32
    %c0_i32_2 = arith.constant 0 : i32
    %c0_i32_3 = arith.constant 0 : i32
    return %arg0, %c0_i32, %c0_i32_0, %c0_i32_1, %c0_i32_2 : i32, i32, i32, i32, i32
  }
  func.func @transform_2(%arg0: i32) -> (i32, i32, i32, i32, i32) {
    %c0_i32 = arith.constant 0 : i32
    %c0_i32_0 = arith.constant 0 : i32
    %c0_i32_1 = arith.constant 0 : i32
    %c0_i32_2 = arith.constant 0 : i32
    %c0_i32_3 = arith.constant 0 : i32
    return %arg0, %c0_i32, %c0_i32_0, %c0_i32_1, %c0_i32_2 : i32, i32, i32, i32, i32
  }
}

</mosaic_0001>

<bundles_post_ra>
// kernel: squeeze.8
= control target key start
LH: loop header
LB: loop body
LE: loop exit
PB: predicated region body
PF: predicated region fallthrough
CT: control target
= control target key end

     0   :  { %vm73_vm0 = vcmask 1047556   ;;  %vm31_vm1 = vcmask 31744   ;;  %s1030_s18 = smov 124   ;;  %s1031_s19 = smov 116   ;;  %s1426_s0 = inlined_call_operand.vmem [shape: f32[2,6,64], index: 0, kind: input, shape index: {}]   ;;  %s1427_s1 = inlined_call_operand.vmem [shape: f32[2,6,4,4,4], index: 1, kind: output, shape index: {}]  }
   0x1   :  { %v962_v0 = vld [vmem:[%s1426_s0 + $0xa] sm:$0x3]  ;;  %v963_v1 = vld [vmem:[%s1426_s0 + $0x8] sm:$0x3]  ;;  %v964_v2 = vld [vmem:[%s1426_s0 + $0x6] sm:$0x3] }
   0x2   :  { %8 = vst [vmem:[#allocation1 + $0x28] sm:$0x3] %v962_v0  ;;  %13 = vst [vmem:[#allocation1 + $0x20] sm:$0x3] %v963_v1  ;;  %v965_v3 = vld [vmem:[%s1426_s0 + $0x4] sm:$0x3] }
   0x3   :  { %18 = vst [vmem:[#allocation1 + $0x18] sm:$0x3] %v964_v2  ;;  %23 = vst [vmem:[#allocation1 + $0x10] sm:$0x3] %v965_v3  ;;  %v966_v4 = vld [vmem:[%s1426_s0 + $0x2] sm:$0x3] }
   0x4   :  { %v28_v5 = vld [vmem:[%s1426_s0] sm:$0x3]  ;;  %27 = vst [vmem:[#allocation1 + $0x8] sm:$0x3] %v966_v4  ;;  %s1029_s0 = smov 120   ;;  %s1032_s20 = smov 112  }
   0x5   :  { %29 = vst [vmem:[#allocation1] sm:$0x3] %v28_v5  ;;  %s1033_s21 = smov 108   ;;  %s1034_s22 = smov 104  }
   0x6   :  { %s1035_s23 = smov 100   ;;  %s1036_s24 = smov 96  }
   0x7   :  { %s1037_s25 = smov 92   ;;  %s1038_s26 = smov 88  }
   0x8   :  { %s1039_s27 = smov 84   ;;  %s1040_s28 = smov 80  }
   0x9   :  { %v1072_v6 = vld.sshfl [vmem:[#allocation1 + $0x20] sm:$0xff pattern:$0x99999810]   ;;  %s1041_s29 = smov 76   ;;  %s1042_s30 = smov 72  }
   0xa   :  { %v57_v7 = vld [vmem:[#allocation1 + $0x20] sm:$0x3]   ;;  %133 = vrot.lane.b32.xlu1 %v1072_v6, %s1029_s0  ;;  %96 = vrot.lane.b32.xlu0 %v1072_v6, %s1030_s18  ;;  %v72_v8 = vld.sshfl [vmem:[#allocation1 + $0x10] sm:$0xff pattern:$0x98100000]   ;;  %s1043_s2 = smov 68  }
   0xb   :  { %62 = vst.msk [vmem:[#allocation0 + $0x11f] sm:$0x2] %vm31_vm1, %v57_v7   ;;  %v64_v9 = vld [vmem:[#allocation1 + $0x28] sm:$0x3]   ;;  %60 = vst.msk [vmem:[#allocation0 + $0x100] sm:$0x1] %vm31_vm1, %v57_v7  }
   0xc   :  { %v70_v10 = vld.sshfl [vmem:[#allocation1] sm:$0xff pattern:$0x99999810]   ;;  %69 = vst.msk [vmem:[#allocation0 + $0x15f] sm:$0x2] %vm31_vm1, %v64_v9  }
   0xd   :  { %67 = vst.msk [vmem:[#allocation0 + $0x140] sm:$0x1] %vm31_vm1, %v64_v9   ;;  %v30_v11 = vld [vmem:[#allocation1] sm:$0x3]   ;;  %v74_v12 = vsel %vm73_vm0, %v72_v8, %v70_v10  ;;  %v36_v13 = vld [vmem:[#allocation1 + $0x8] sm:$0x3]  }
   0xe   :  { %32 = vst.msk [vmem:[#allocation0] sm:$0x1] %vm31_vm1, %v30_v11   ;;  %34 = vst.msk [vmem:[#allocation0 + $0x1f] sm:$0x2] %vm31_vm1, %v30_v11   ;;  %v43_v14 = vld [vmem:[#allocation1 + $0x10] sm:$0x3]   ;;  %170 = vrot.lane.b32.xlu1 %v1072_v6, %s1031_s19  ;;  %75 = vrot.lane.b32.xlu0 %v74_v12, %s1030_s18 }
   0xf   :  { %v50_v15 = vld [vmem:[#allocation1 + $0x18] sm:$0x3]   ;;  %39 = vst.msk [vmem:[#allocation0 + $0x40] sm:$0x1] %vm31_vm1, %v36_v13   ;;  %41 = vst.msk [vmem:[#allocation0 + $0x5f] sm:$0x2] %vm31_vm1, %v36_v13  }
  0x10   :  { %46 = vst.msk [vmem:[#allocation0 + $0x80] sm:$0x1] %vm31_vm1, %v43_v14   ;;  %53 = vst.msk [vmem:[#allocation0 + $0xc0] sm:$0x1] %vm31_vm1, %v50_v15  }
  0x11   :  { %48 = vst.msk [vmem:[#allocation0 + $0x9f] sm:$0x2] %vm31_vm1, %v43_v14   ;;  %55 = vst.msk [vmem:[#allocation0 + $0xdf] sm:$0x2] %vm31_vm1, %v50_v15  }
  0x12   :  { %112 = vrot.lane.b32.xlu1 %v74_v12, %s1029_s0  ;;  %149 = vrot.lane.b32.xlu0 %v74_v12, %s1031_s19 }
  0x16   :  { %207 = vrot.lane.b32.xlu1 %v1072_v6, %s1032_s20  ;;  %186 = vrot.lane.b32.xlu0 %v74_v12, %s1032_s20 }
  0x1a   :  { %244 = vrot.lane.b32.xlu1 %v1072_v6, %s1033_s21  ;;  %223 = vrot.lane.b32.xlu0 %v74_v12, %s1033_s21 }
  0x1e   :  { %281 = vrot.lane.b32.xlu1 %v1072_v6, %s1034_s22  ;;  %260 = vrot.lane.b32.xlu0 %v74_v12, %s1034_s22 }
  0x22   :  { %318 = vrot.lane.b32.xlu1 %v1072_v6, %s1035_s23  ;;  %297 = vrot.lane.b32.xlu0 %v74_v12, %s1035_s23 }
  0x26   :  { %355 = vrot.lane.b32.xlu1 %v1072_v6, %s1036_s24  ;;  %334 = vrot.lane.b32.xlu0 %v74_v12, %s1036_s24 }
  0x2a   :  { %392 = vrot.lane.b32.xlu1 %v1072_v6, %s1037_s25  ;;  %371 = vrot.lane.b32.xlu0 %v74_v12, %s1037_s25 }
  0x2e   :  { %429 = vrot.lane.b32.xlu1 %v1072_v6, %s1038_s26  ;;  %408 = vrot.lane.b32.xlu0 %v74_v12, %s1038_s26 }
  0x32   :  { %466 = vrot.lane.b32.xlu1 %v1072_v6, %s1039_s27  ;;  %445 = vrot.lane.b32.xlu0 %v74_v12, %s1039_s27 }
  0x36   :  { %503 = vrot.lane.b32.xlu1 %v1072_v6, %s1040_s28  ;;  %482 = vrot.lane.b32.xlu0 %v74_v12, %s1040_s28 }
  0x3a   :  { %540 = vrot.lane.b32.xlu1 %v1072_v6, %s1041_s29  ;;  %519 = vrot.lane.b32.xlu0 %v74_v12, %s1041_s29 }
  0x3e   :  { %577 = vrot.lane.b32.xlu1 %v1072_v6, %s1042_s30  ;;  %556 = vrot.lane.b32.xlu0 %v74_v12, %s1042_s30 }
  0x42   :  { %614 = vrot.lane.b32.xlu1 %v1072_v6, %s1043_s2  ;;  %593 = vrot.lane.b32.xlu0 %v74_v12, %s1043_s2 }
  0x7c   :  { %v134_v16 = vpop.permute.xlu1 %133   ;;  %v97_v17 = vpop.permute.xlu0 %96  }
  0x7d   :  { %137 = vst.msk [vmem:[#allocation0 + $0x102] sm:$0x1] %vm31_vm1, %v134_v16   ;;  %139 = vst.msk [vmem:[#allocation0 + $0x121] sm:$0x2] %vm31_vm1, %v134_v16  }
  0x7e   :  { %141 = vst.msk [vmem:[#allocation0 + $0x140] sm:$0x4] %vm31_vm1, %v134_v16   ;;  %143 = vst.msk [vmem:[#allocation0 + $0x15f] sm:$0x8] %vm31_vm1, %v134_v16  }
  0x7f   :  { %100 = vst.msk [vmem:[#allocation0 + $0x101] sm:$0x1] %vm31_vm1, %v97_v17   ;;  %102 = vst.msk [vmem:[#allocation0 + $0x120] sm:$0x2] %vm31_vm1, %v97_v17  }
  0x80   :  { %104 = vst.msk [vmem:[#allocation0 + $0x13f] sm:$0x4] %vm31_vm1, %v97_v17   ;;  %106 = vst.msk [vmem:[#allocation0 + $0x15e] sm:$0x8] %vm31_vm1, %v97_v17   ;;  %v171_v18 = vpop.permute.xlu1 %170   ;;  %v76_v19 = vpop.permute.xlu0 %75  }
  0x81   :  { %174 = vst.msk [vmem:[#allocation0 + $0x103] sm:$0x1] %vm31_vm1, %v171_v18   ;;  %176 = vst.msk [vmem:[#allocation0 + $0x122] sm:$0x2] %vm31_vm1, %v171_v18  }
  0x82   :  { %178 = vst.msk [vmem:[#allocation0 + $0x141] sm:$0x4] %vm31_vm1, %v171_v18   ;;  %180 = vst.msk [vmem:[#allocation0 + $0x160] sm:$0x8] %vm31_vm1, %v171_v18  }
  0x83   :  { %79 = vst.msk [vmem:[#allocation0 + $0x1] sm:$0x1] %vm31_vm1, %v76_v19   ;;  %81 = vst.msk [vmem:[#allocation0 + $0x20] sm:$0x2] %vm31_vm1, %v76_v19  }
  0x84   :  { %83 = vst.msk [vmem:[#allocation0 + $0x3f] sm:$0x4] %vm31_vm1, %v76_v19   ;;  %85 = vst.msk [vmem:[#allocation0 + $0x5e] sm:$0x8] %vm31_vm1, %v76_v19   ;;  %v113_v20 = vpop.permute.xlu1 %112   ;;  %v150_v21 = vpop.permute.xlu0 %149  }
  0x85   :  { %87 = vst.msk [vmem:[#allocation0 + $0x7d] sm:$0x10] %vm31_vm1, %v76_v19   ;;  %89 = vst.msk [vmem:[#allocation0 + $0x9c] sm:$0x20] %vm31_vm1, %v76_v19  }
  0x86   :  { %91 = vst.msk [vmem:[#allocation0 + $0xbb] sm:$0x40] %vm31_vm1, %v76_v19   ;;  %93 = vst.msk [vmem:[#allocation0 + $0xda] sm:$0x80] %vm31_vm1, %v76_v19  }
  0x87   :  { %116 = vst.msk [vmem:[#allocation0 + $0x2] sm:$0x1] %vm31_vm1, %v113_v20   ;;  %118 = vst.msk [vmem:[#allocation0 + $0x21] sm:$0x2] %vm31_vm1, %v113_v20  }
  0x88   :  { %120 = vst.msk [vmem:[#allocation0 + $0x40] sm:$0x4] %vm31_vm1, %v113_v20   ;;  %122 = vst.msk [vmem:[#allocation0 + $0x5f] sm:$0x8] %vm31_vm1, %v113_v20   ;;  %v817_v22 = vld [vmem:[#allocation0 + $0x100] sm:$0xf]  ;;  %v208_v25 = vpop.permute.xlu1 %207   ;;  %v187_v26 = vpop.permute.xlu0 %186  }
  0x89   :  { %124 = vst.msk [vmem:[#allocation0 + $0x7e] sm:$0x10] %vm31_vm1, %v113_v20   ;;  %126 = vst.msk [vmem:[#allocation0 + $0x9d] sm:$0x20] %vm31_vm1, %v113_v20   ;;  %v865_v23 = vld [vmem:[#allocation0 + $0x140] sm:$0xf] }
  0x8a   :  { %128 = vst.msk [vmem:[#allocation0 + $0xbc] sm:$0x40] %vm31_vm1, %v113_v20   ;;  %130 = vst.msk [vmem:[#allocation0 + $0xdb] sm:$0x80] %vm31_vm1, %v113_v20   ;;  %v841_v24 = vld [vmem:[#allocation0 + $0x120] sm:$0xf] }
  0x8b   :  { %153 = vst.msk [vmem:[#allocation0 + $0x3] sm:$0x1] %vm31_vm1, %v150_v21   ;;  %155 = vst.msk [vmem:[#allocation0 + $0x22] sm:$0x2] %vm31_vm1, %v150_v21   ;;  %v889_v27 = vld [vmem:[#allocation0 + $0x160] sm:$0xf] }
  0x8c   :  { %157 = vst.msk [vmem:[#allocation0 + $0x41] sm:$0x4] %vm31_vm1, %v150_v21   ;;  %159 = vst.msk [vmem:[#allocation0 + $0x60] sm:$0x8] %vm31_vm1, %v150_v21   ;;  %v245_v31 = vpop.permute.xlu1 %244   ;;  %v224_v32 = vpop.permute.xlu0 %223  }
  0x8d   :  { %161 = vst.msk [vmem:[#allocation0 + $0x7f] sm:$0x10] %vm31_vm1, %v150_v21   ;;  %163 = vst.msk [vmem:[#allocation0 + $0x9e] sm:$0x20] %vm31_vm1, %v150_v21  }
  0x8e   :  { %165 = vst.msk [vmem:[#allocation0 + $0xbd] sm:$0x40] %vm31_vm1, %v150_v21   ;;  %167 = vst.msk [vmem:[#allocation0 + $0xdc] sm:$0x80] %vm31_vm1, %v150_v21  }
  0x8f   :  { %998 = vst [vmem:[%s1427_s1 + $0x80] sm:$0xf] %v817_v22  ;;  %1006 = vst [vmem:[%s1427_s1 + $0xa0] sm:$0xf] %v865_v23 }
  0x90   :  { %1002 = vst [vmem:[%s1427_s1 + $0x90] sm:$0xf] %v841_v24  ;;  %211 = vst.msk [vmem:[#allocation0 + $0x108] sm:$0x1] %vm31_vm1, %v208_v25   ;;  %v282_v38 = vpop.permute.xlu1 %281   ;;  %v261_v39 = vpop.permute.xlu0 %260  }
  0x91   :  { %213 = vst.msk [vmem:[#allocation0 + $0x127] sm:$0x2] %vm31_vm1, %v208_v25   ;;  %215 = vst.msk [vmem:[#allocation0 + $0x146] sm:$0x4] %vm31_vm1, %v208_v25  }
  0x92   :  { %217 = vst.msk [vmem:[#allocation0 + $0x165] sm:$0x8] %vm31_vm1, %v208_v25   ;;  %190 = vst.msk [vmem:[#allocation0 + $0x8] sm:$0x1] %vm31_vm1, %v187_v26   ;;  %v628_v29 = vld [vmem:[#allocation0] sm:$0xf] }
  0x93   :  { %192 = vst.msk [vmem:[#allocation0 + $0x27] sm:$0x2] %vm31_vm1, %v187_v26   ;;  %194 = vst.msk [vmem:[#allocation0 + $0x46] sm:$0x4] %vm31_vm1, %v187_v26   ;;  %v649_v30 = vld [vmem:[#allocation0 + $0x20] sm:$0xf] }
  0x94   :  { %196 = vst.msk [vmem:[#allocation0 + $0x65] sm:$0x8] %vm31_vm1, %v187_v26   ;;  %198 = vst.msk [vmem:[#allocation0 + $0x84] sm:$0x10] %vm31_vm1, %v187_v26   ;;  %v745_v28 = vld [vmem:[#allocation0 + $0xa0] sm:$0xf]  ;;  %v319_v40 = vpop.permute.xlu1 %318   ;;  %v298_v41 = vpop.permute.xlu0 %297  }
  0x95   :  { %200 = vst.msk [vmem:[#allocation0 + $0xa3] sm:$0x20] %vm31_vm1, %v187_v26   ;;  %202 = vst.msk [vmem:[#allocation0 + $0xc2] sm:$0x40] %vm31_vm1, %v187_v26   ;;  %v673_v33 = vld [vmem:[#allocation0 + $0x40] sm:$0xf] }
  0x96   :  { %204 = vst.msk [vmem:[#allocation0 + $0xe1] sm:$0x80] %vm31_vm1, %v187_v26   ;;  %1010 = vst [vmem:[%s1427_s1 + $0xb0] sm:$0xf] %v889_v27  ;;  %v697_v34 = vld [vmem:[#allocation0 + $0x60] sm:$0xf] }
  0x97   :  { %986 = vst [vmem:[%s1427_s1 + $0x50] sm:$0xf] %v745_v28  ;;  %v721_v35 = vld [vmem:[#allocation0 + $0x80] sm:$0xf]  ;;  %630 = vst [vmem:[%s1427_s1] sm:$0xf] %v628_v29 }
  0x98   :  { %970 = vst [vmem:[%s1427_s1 + $0x10] sm:$0xf] %v649_v30  ;;  %248 = vst.msk [vmem:[#allocation0 + $0x109] sm:$0x1] %vm31_vm1, %v245_v31   ;;  %v769_v36 = vld [vmem:[#allocation0 + $0xc0] sm:$0xf]  ;;  %v356_v42 = vpop.permute.xlu1 %355   ;;  %v335_v43 = vpop.permute.xlu0 %334  }
  0x99   :  { %250 = vst.msk [vmem:[#allocation0 + $0x128] sm:$0x2] %vm31_vm1, %v245_v31   ;;  %252 = vst.msk [vmem:[#allocation0 + $0x147] sm:$0x4] %vm31_vm1, %v245_v31   ;;  %v793_v37 = vld [vmem:[#allocation0 + $0xe0] sm:$0xf] }
  0x9a   :  { %254 = vst.msk [vmem:[#allocation0 + $0x166] sm:$0x8] %vm31_vm1, %v245_v31   ;;  %227 = vst.msk [vmem:[#allocation0 + $0x9] sm:$0x1] %vm31_vm1, %v224_v32  }
  0x9b   :  { %229 = vst.msk [vmem:[#allocation0 + $0x28] sm:$0x2] %vm31_vm1, %v224_v32   ;;  %231 = vst.msk [vmem:[#allocation0 + $0x47] sm:$0x4] %vm31_vm1, %v224_v32  }
  0x9c   :  { %233 = vst.msk [vmem:[#allocation0 + $0x66] sm:$0x8] %vm31_vm1, %v224_v32   ;;  %235 = vst.msk [vmem:[#allocation0 + $0x85] sm:$0x10] %vm31_vm1, %v224_v32   ;;  %v393_v47 = vpop.permute.xlu1 %392   ;;  %v372_v48 = vpop.permute.xlu0 %371  }
  0x9d   :  { %237 = vst.msk [vmem:[#allocation0 + $0xa4] sm:$0x20] %vm31_vm1, %v224_v32   ;;  %239 = vst.msk [vmem:[#allocation0 + $0xc3] sm:$0x40] %vm31_vm1, %v224_v32  }
  0x9e   :  { %241 = vst.msk [vmem:[#allocation0 + $0xe2] sm:$0x80] %vm31_vm1, %v224_v32   ;;  %974 = vst [vmem:[%s1427_s1 + $0x20] sm:$0xf] %v673_v33 }
  0x9f   :  { %978 = vst [vmem:[%s1427_s1 + $0x30] sm:$0xf] %v697_v34  ;;  %982 = vst [vmem:[%s1427_s1 + $0x40] sm:$0xf] %v721_v35 }
  0xa0   :  { %990 = vst [vmem:[%s1427_s1 + $0x60] sm:$0xf] %v769_v36  ;;  %994 = vst [vmem:[%s1427_s1 + $0x70] sm:$0xf] %v793_v37  ;;  %v430_v58 = vpop.permute.xlu1 %429   ;;  %v409_v59 = vpop.permute.xlu0 %408  }
  0xa1   :  { %285 = vst.msk [vmem:[#allocation0 + $0x10a] sm:$0x1] %vm31_vm1, %v282_v38   ;;  %287 = vst.msk [vmem:[#allocation0 + $0x129] sm:$0x2] %vm31_vm1, %v282_v38  }
  0xa2   :  { %289 = vst.msk [vmem:[#allocation0 + $0x148] sm:$0x4] %vm31_vm1, %v282_v38   ;;  %291 = vst.msk [vmem:[#allocation0 + $0x167] sm:$0x8] %vm31_vm1, %v282_v38  }
  0xa3   :  { %264 = vst.msk [vmem:[#allocation0 + $0xa] sm:$0x1] %vm31_vm1, %v261_v39   ;;  %266 = vst.msk [vmem:[#allocation0 + $0x29] sm:$0x2] %vm31_vm1, %v261_v39  }
  0xa4   :  { %268 = vst.msk [vmem:[#allocation0 + $0x48] sm:$0x4] %vm31_vm1, %v261_v39   ;;  %270 = vst.msk [vmem:[#allocation0 + $0x67] sm:$0x8] %vm31_vm1, %v261_v39   ;;  %v467_v60 = vpop.permute.xlu1 %466   ;;  %v446_v61 = vpop.permute.xlu0 %445  }
  0xa5   :  { %272 = vst.msk [vmem:[#allocation0 + $0x86] sm:$0x10] %vm31_vm1, %v261_v39   ;;  %274 = vst.msk [vmem:[#allocation0 + $0xa5] sm:$0x20] %vm31_vm1, %v261_v39  }
  0xa6   :  { %276 = vst.msk [vmem:[#allocation0 + $0xc4] sm:$0x40] %vm31_vm1, %v261_v39   ;;  %278 = vst.msk [vmem:[#allocation0 + $0xe3] sm:$0x80] %vm31_vm1, %v261_v39  }
  0xa7   :  { %322 = vst.msk [vmem:[#allocation0 + $0x10b] sm:$0x1] %vm31_vm1, %v319_v40   ;;  %324 = vst.msk [vmem:[#allocation0 + $0x12a] sm:$0x2] %vm31_vm1, %v319_v40  }
  0xa8   :  { %326 = vst.msk [vmem:[#allocation0 + $0x149] sm:$0x4] %vm31_vm1, %v319_v40   ;;  %328 = vst.msk [vmem:[#allocation0 + $0x168] sm:$0x8] %vm31_vm1, %v319_v40   ;;  %v504_v62 = vpop.permute.xlu1 %503   ;;  %v483_v63 = vpop.permute.xlu0 %482  }
  0xa9   :  { %301 = vst.msk [vmem:[#allocation0 + $0xb] sm:$0x1] %vm31_vm1, %v298_v41   ;;  %303 = vst.msk [vmem:[#allocation0 + $0x2a] sm:$0x2] %vm31_vm1, %v298_v41  }
  0xaa   :  { %305 = vst.msk [vmem:[#allocation0 + $0x49] sm:$0x4] %vm31_vm1, %v298_v41   ;;  %307 = vst.msk [vmem:[#allocation0 + $0x68] sm:$0x8] %vm31_vm1, %v298_v41  }
  0xab   :  { %309 = vst.msk [vmem:[#allocation0 + $0x87] sm:$0x10] %vm31_vm1, %v298_v41   ;;  %311 = vst.msk [vmem:[#allocation0 + $0xa6] sm:$0x20] %vm31_vm1, %v298_v41  }
  0xac   :  { %313 = vst.msk [vmem:[#allocation0 + $0xc5] sm:$0x40] %vm31_vm1, %v298_v41   ;;  %315 = vst.msk [vmem:[#allocation0 + $0xe4] sm:$0x80] %vm31_vm1, %v298_v41   ;;  %v541_v3 = vpop.permute.xlu1 %540   ;;  %v520_v4 = vpop.permute.xlu0 %519  }
  0xad   :  { %359 = vst.msk [vmem:[#allocation0 + $0x110] sm:$0x1] %vm31_vm1, %v356_v42   ;;  %361 = vst.msk [vmem:[#allocation0 + $0x12f] sm:$0x2] %vm31_vm1, %v356_v42  }
  0xae   :  { %363 = vst.msk [vmem:[#allocation0 + $0x14e] sm:$0x4] %vm31_vm1, %v356_v42   ;;  %365 = vst.msk [vmem:[#allocation0 + $0x16d] sm:$0x8] %vm31_vm1, %v356_v42   ;;  %v823_v45 = vld [vmem:[#allocation0 + $0x108] sm:$0xf] }
  0xaf   :  { %338 = vst.msk [vmem:[#allocation0 + $0x10] sm:$0x1] %vm31_vm1, %v335_v43   ;;  %340 = vst.msk [vmem:[#allocation0 + $0x2f] sm:$0x2] %vm31_vm1, %v335_v43   ;;  %v871_v44 = vld [vmem:[#allocation0 + $0x148] sm:$0xf] }
  0xb0   :  { %342 = vst.msk [vmem:[#allocation0 + $0x4e] sm:$0x4] %vm31_vm1, %v335_v43   ;;  %344 = vst.msk [vmem:[#allocation0 + $0x6d] sm:$0x8] %vm31_vm1, %v335_v43   ;;  %v847_v46 = vld [vmem:[#allocation0 + $0x128] sm:$0xf]  ;;  %v578_v14 = vpop.permute.xlu1 %577   ;;  %v557_v15 = vpop.permute.xlu0 %556  }
  0xb1   :  { %346 = vst.msk [vmem:[#allocation0 + $0x8c] sm:$0x10] %vm31_vm1, %v335_v43   ;;  %348 = vst.msk [vmem:[#allocation0 + $0xab] sm:$0x20] %vm31_vm1, %v335_v43   ;;  %v895_v49 = vld [vmem:[#allocation0 + $0x168] sm:$0xf] }
  0xb2   :  { %350 = vst.msk [vmem:[#allocation0 + $0xca] sm:$0x40] %vm31_vm1, %v335_v43   ;;  %352 = vst.msk [vmem:[#allocation0 + $0xe9] sm:$0x80] %vm31_vm1, %v335_v43   ;;  %v632_v50 = vld [vmem:[#allocation0 + $0x8] sm:$0xf] }
  0xb3   :  { %1007 = vst [vmem:[%s1427_s1 + $0xa4] sm:$0xf] %v871_v44  ;;  %v655_v51 = vld [vmem:[#allocation0 + $0x28] sm:$0xf]  ;;  %999 = vst [vmem:[%s1427_s1 + $0x84] sm:$0xf] %v823_v45 }
  0xb4   :  { %1003 = vst [vmem:[%s1427_s1 + $0x94] sm:$0xf] %v847_v46  ;;  %396 = vst.msk [vmem:[#allocation0 + $0x111] sm:$0x1] %vm31_vm1, %v393_v47   ;;  %v679_v52 = vld [vmem:[#allocation0 + $0x48] sm:$0xf]  ;;  %v615_v16 = vpop.permute.xlu1 %614   ;;  %v594_v17 = vpop.permute.xlu0 %593  }
  0xb5   :  { %398 = vst.msk [vmem:[#allocation0 + $0x130] sm:$0x2] %vm31_vm1, %v393_v47   ;;  %400 = vst.msk [vmem:[#allocation0 + $0x14f] sm:$0x4] %vm31_vm1, %v393_v47   ;;  %v703_v53 = vld [vmem:[#allocation0 + $0x68] sm:$0xf] }
  0xb6   :  { %402 = vst.msk [vmem:[#allocation0 + $0x16e] sm:$0x8] %vm31_vm1, %v393_v47   ;;  %375 = vst.msk [vmem:[#allocation0 + $0x11] sm:$0x1] %vm31_vm1, %v372_v48   ;;  %v751_v54 = vld [vmem:[#allocation0 + $0xa8] sm:$0xf] }
  0xb7   :  { %377 = vst.msk [vmem:[#allocation0 + $0x30] sm:$0x2] %vm31_vm1, %v372_v48   ;;  %379 = vst.msk [vmem:[#allocation0 + $0x4f] sm:$0x4] %vm31_vm1, %v372_v48   ;;  %v775_v55 = vld [vmem:[#allocation0 + $0xc8] sm:$0xf] }
  0xb8   :  { %381 = vst.msk [vmem:[#allocation0 + $0x6e] sm:$0x8] %vm31_vm1, %v372_v48   ;;  %383 = vst.msk [vmem:[#allocation0 + $0x8d] sm:$0x10] %vm31_vm1, %v372_v48   ;;  %v727_v56 = vld [vmem:[#allocation0 + $0x88] sm:$0xf] }
  0xb9   :  { %385 = vst.msk [vmem:[#allocation0 + $0xac] sm:$0x20] %vm31_vm1, %v372_v48   ;;  %387 = vst.msk [vmem:[#allocation0 + $0xcb] sm:$0x40] %vm31_vm1, %v372_v48   ;;  %v799_v57 = vld [vmem:[#allocation0 + $0xe8] sm:$0xf] }
  0xba   :  { %389 = vst.msk [vmem:[#allocation0 + $0xea] sm:$0x80] %vm31_vm1, %v372_v48   ;;  %967 = vst [vmem:[%s1427_s1 + $0x4] sm:$0xf] %v632_v50 }
  0xbb   :  { %971 = vst [vmem:[%s1427_s1 + $0x14] sm:$0xf] %v655_v51  ;;  %1011 = vst [vmem:[%s1427_s1 + $0xb4] sm:$0xf] %v895_v49 }
  0xbc   :  { %975 = vst [vmem:[%s1427_s1 + $0x24] sm:$0xf] %v679_v52  ;;  %979 = vst [vmem:[%s1427_s1 + $0x34] sm:$0xf] %v703_v53 }
  0xbd   :  { %987 = vst [vmem:[%s1427_s1 + $0x54] sm:$0xf] %v751_v54  ;;  %991 = vst [vmem:[%s1427_s1 + $0x64] sm:$0xf] %v775_v55 }
  0xbe   :  { %983 = vst [vmem:[%s1427_s1 + $0x44] sm:$0xf] %v727_v56  ;;  %995 = vst [vmem:[%s1427_s1 + $0x74] sm:$0xf] %v799_v57 }
  0xbf   :  { %433 = vst.msk [vmem:[#allocation0 + $0x112] sm:$0x1] %vm31_vm1, %v430_v58   ;;  %435 = vst.msk [vmem:[#allocation0 + $0x131] sm:$0x2] %vm31_vm1, %v430_v58  }
  0xc0   :  { %437 = vst.msk [vmem:[#allocation0 + $0x150] sm:$0x4] %vm31_vm1, %v430_v58   ;;  %439 = vst.msk [vmem:[#allocation0 + $0x16f] sm:$0x8] %vm31_vm1, %v430_v58  }
  0xc1   :  { %412 = vst.msk [vmem:[#allocation0 + $0x12] sm:$0x1] %vm31_vm1, %v409_v59   ;;  %414 = vst.msk [vmem:[#allocation0 + $0x31] sm:$0x2] %vm31_vm1, %v409_v59  }
  0xc2   :  { %416 = vst.msk [vmem:[#allocation0 + $0x50] sm:$0x4] %vm31_vm1, %v409_v59   ;;  %418 = vst.msk [vmem:[#allocation0 + $0x6f] sm:$0x8] %vm31_vm1, %v409_v59  }
  0xc3   :  { %420 = vst.msk [vmem:[#allocation0 + $0x8e] sm:$0x10] %vm31_vm1, %v409_v59   ;;  %422 = vst.msk [vmem:[#allocation0 + $0xad] sm:$0x20] %vm31_vm1, %v409_v59  }
  0xc4   :  { %424 = vst.msk [vmem:[#allocation0 + $0xcc] sm:$0x40] %vm31_vm1, %v409_v59   ;;  %426 = vst.msk [vmem:[#allocation0 + $0xeb] sm:$0x80] %vm31_vm1, %v409_v59  }
  0xc5   :  { %470 = vst.msk [vmem:[#allocation0 + $0x113] sm:$0x1] %vm31_vm1, %v467_v60   ;;  %472 = vst.msk [vmem:[#allocation0 + $0x132] sm:$0x2] %vm31_vm1, %v467_v60  }
  0xc6   :  { %474 = vst.msk [vmem:[#allocation0 + $0x151] sm:$0x4] %vm31_vm1, %v467_v60   ;;  %476 = vst.msk [vmem:[#allocation0 + $0x170] sm:$0x8] %vm31_vm1, %v467_v60  }
  0xc7   :  { %449 = vst.msk [vmem:[#allocation0 + $0x13] sm:$0x1] %vm31_vm1, %v446_v61   ;;  %451 = vst.msk [vmem:[#allocation0 + $0x32] sm:$0x2] %vm31_vm1, %v446_v61  }
  0xc8   :  { %453 = vst.msk [vmem:[#allocation0 + $0x51] sm:$0x4] %vm31_vm1, %v446_v61   ;;  %455 = vst.msk [vmem:[#allocation0 + $0x70] sm:$0x8] %vm31_vm1, %v446_v61  }
  0xc9   :  { %457 = vst.msk [vmem:[#allocation0 + $0x8f] sm:$0x10] %vm31_vm1, %v446_v61   ;;  %459 = vst.msk [vmem:[#allocation0 + $0xae] sm:$0x20] %vm31_vm1, %v446_v61  }
  0xca   :  { %461 = vst.msk [vmem:[#allocation0 + $0xcd] sm:$0x40] %vm31_vm1, %v446_v61   ;;  %463 = vst.msk [vmem:[#allocation0 + $0xec] sm:$0x80] %vm31_vm1, %v446_v61  }
  0xcb   :  { %507 = vst.msk [vmem:[#allocation0 + $0x118] sm:$0x1] %vm31_vm1, %v504_v62   ;;  %509 = vst.msk [vmem:[#allocation0 + $0x137] sm:$0x2] %vm31_vm1, %v504_v62  }
  0xcc   :  { %511 = vst.msk [vmem:[#allocation0 + $0x156] sm:$0x4] %vm31_vm1, %v504_v62   ;;  %513 = vst.msk [vmem:[#allocation0 + $0x175] sm:$0x8] %vm31_vm1, %v504_v62   ;;  %v829_v0 = vld [vmem:[#allocation0 + $0x110] sm:$0xf] }
  0xcd   :  { %486 = vst.msk [vmem:[#allocation0 + $0x18] sm:$0x1] %vm31_vm1, %v483_v63   ;;  %488 = vst.msk [vmem:[#allocation0 + $0x37] sm:$0x2] %vm31_vm1, %v483_v63   ;;  %v853_v1 = vld [vmem:[#allocation0 + $0x130] sm:$0xf] }
  0xce   :  { %490 = vst.msk [vmem:[#allocation0 + $0x56] sm:$0x4] %vm31_vm1, %v483_v63   ;;  %492 = vst.msk [vmem:[#allocation0 + $0x75] sm:$0x8] %vm31_vm1, %v483_v63   ;;  %v877_v2 = vld [vmem:[#allocation0 + $0x150] sm:$0xf] }
  0xcf   :  { %494 = vst.msk [vmem:[#allocation0 + $0x94] sm:$0x10] %vm31_vm1, %v483_v63   ;;  %496 = vst.msk [vmem:[#allocation0 + $0xb3] sm:$0x20] %vm31_vm1, %v483_v63   ;;  %v901_v5 = vld [vmem:[#allocation0 + $0x170] sm:$0xf] }
  0xd0   :  { %498 = vst.msk [vmem:[#allocation0 + $0xd2] sm:$0x40] %vm31_vm1, %v483_v63   ;;  %500 = vst.msk [vmem:[#allocation0 + $0xf1] sm:$0x80] %vm31_vm1, %v483_v63   ;;  %v733_v6 = vld [vmem:[#allocation0 + $0x90] sm:$0xf] }
  0xd1   :  { %v637_v7 = vld [vmem:[#allocation0 + $0x10] sm:$0xf]  ;;  %1000 = vst [vmem:[%s1427_s1 + $0x88] sm:$0xf] %v829_v0  ;;  %1004 = vst [vmem:[%s1427_s1 + $0x98] sm:$0xf] %v853_v1 }
  0xd2   :  { %1008 = vst [vmem:[%s1427_s1 + $0xa8] sm:$0xf] %v877_v2  ;;  %544 = vst.msk [vmem:[#allocation0 + $0x119] sm:$0x1] %vm31_vm1, %v541_v3   ;;  %v661_v8 = vld [vmem:[#allocation0 + $0x30] sm:$0xf] }
  0xd3   :  { %546 = vst.msk [vmem:[#allocation0 + $0x138] sm:$0x2] %vm31_vm1, %v541_v3   ;;  %548 = vst.msk [vmem:[#allocation0 + $0x157] sm:$0x4] %vm31_vm1, %v541_v3   ;;  %v685_v9 = vld [vmem:[#allocation0 + $0x50] sm:$0xf] }
  0xd4   :  { %550 = vst.msk [vmem:[#allocation0 + $0x176] sm:$0x8] %vm31_vm1, %v541_v3   ;;  %523 = vst.msk [vmem:[#allocation0 + $0x19] sm:$0x1] %vm31_vm1, %v520_v4   ;;  %v709_v10 = vld [vmem:[#allocation0 + $0x70] sm:$0xf] }
  0xd5   :  { %525 = vst.msk [vmem:[#allocation0 + $0x38] sm:$0x2] %vm31_vm1, %v520_v4   ;;  %527 = vst.msk [vmem:[#allocation0 + $0x57] sm:$0x4] %vm31_vm1, %v520_v4   ;;  %v757_v11 = vld [vmem:[#allocation0 + $0xb0] sm:$0xf] }
  0xd6   :  { %529 = vst.msk [vmem:[#allocation0 + $0x76] sm:$0x8] %vm31_vm1, %v520_v4   ;;  %531 = vst.msk [vmem:[#allocation0 + $0x95] sm:$0x10] %vm31_vm1, %v520_v4   ;;  %v781_v12 = vld [vmem:[#allocation0 + $0xd0] sm:$0xf] }
  0xd7   :  { %533 = vst.msk [vmem:[#allocation0 + $0xb4] sm:$0x20] %vm31_vm1, %v520_v4   ;;  %535 = vst.msk [vmem:[#allocation0 + $0xd3] sm:$0x40] %vm31_vm1, %v520_v4   ;;  %v805_v13 = vld [vmem:[#allocation0 + $0xf0] sm:$0xf] }
  0xd8   :  { %537 = vst.msk [vmem:[#allocation0 + $0xf2] sm:$0x80] %vm31_vm1, %v520_v4   ;;  %984 = vst [vmem:[%s1427_s1 + $0x48] sm:$0xf] %v733_v6 }
  0xd9   :  { %1012 = vst [vmem:[%s1427_s1 + $0xb8] sm:$0xf] %v901_v5  ;;  %968 = vst [vmem:[%s1427_s1 + $0x8] sm:$0xf] %v637_v7 }
  0xda   :  { %972 = vst [vmem:[%s1427_s1 + $0x18] sm:$0xf] %v661_v8  ;;  %976 = vst [vmem:[%s1427_s1 + $0x28] sm:$0xf] %v685_v9 }
  0xdb   :  { %980 = vst [vmem:[%s1427_s1 + $0x38] sm:$0xf] %v709_v10  ;;  %988 = vst [vmem:[%s1427_s1 + $0x58] sm:$0xf] %v757_v11 }
  0xdc   :  { %992 = vst [vmem:[%s1427_s1 + $0x68] sm:$0xf] %v781_v12  ;;  %996 = vst [vmem:[%s1427_s1 + $0x78] sm:$0xf] %v805_v13 }
  0xdd   :  { %581 = vst.msk [vmem:[#allocation0 + $0x11a] sm:$0x1] %vm31_vm1, %v578_v14   ;;  %583 = vst.msk [vmem:[#allocation0 + $0x139] sm:$0x2] %vm31_vm1, %v578_v14  }
  0xde   :  { %585 = vst.msk [vmem:[#allocation0 + $0x158] sm:$0x4] %vm31_vm1, %v578_v14   ;;  %587 = vst.msk [vmem:[#allocation0 + $0x177] sm:$0x8] %vm31_vm1, %v578_v14  }
  0xdf   :  { %560 = vst.msk [vmem:[#allocation0 + $0x1a] sm:$0x1] %vm31_vm1, %v557_v15   ;;  %562 = vst.msk [vmem:[#allocation0 + $0x39] sm:$0x2] %vm31_vm1, %v557_v15  }
  0xe0   :  { %564 = vst.msk [vmem:[#allocation0 + $0x58] sm:$0x4] %vm31_vm1, %v557_v15   ;;  %566 = vst.msk [vmem:[#allocation0 + $0x77] sm:$0x8] %vm31_vm1, %v557_v15  }
  0xe1   :  { %568 = vst.msk [vmem:[#allocation0 + $0x96] sm:$0x10] %vm31_vm1, %v557_v15   ;;  %570 = vst.msk [vmem:[#allocation0 + $0xb5] sm:$0x20] %vm31_vm1, %v557_v15  }
  0xe2   :  { %572 = vst.msk [vmem:[#allocation0 + $0xd4] sm:$0x40] %vm31_vm1, %v557_v15   ;;  %574 = vst.msk [vmem:[#allocation0 + $0xf3] sm:$0x80] %vm31_vm1, %v557_v15  }
  0xe3   :  { %618 = vst.msk [vmem:[#allocation0 + $0x11b] sm:$0x1] %vm31_vm1, %v615_v16   ;;  %620 = vst.msk [vmem:[#allocation0 + $0x13a] sm:$0x2] %vm31_vm1, %v615_v16  }
  0xe4   :  { %622 = vst.msk [vmem:[#allocation0 + $0x159] sm:$0x4] %vm31_vm1, %v615_v16   ;;  %624 = vst.msk [vmem:[#allocation0 + $0x178] sm:$0x8] %vm31_vm1, %v615_v16  }
  0xe5   :  { %597 = vst.msk [vmem:[#allocation0 + $0x1b] sm:$0x1] %vm31_vm1, %v594_v17   ;;  %599 = vst.msk [vmem:[#allocation0 + $0x3a] sm:$0x2] %vm31_vm1, %v594_v17  }
  0xe6   :  { %601 = vst.msk [vmem:[#allocation0 + $0x59] sm:$0x4] %vm31_vm1, %v594_v17   ;;  %603 = vst.msk [vmem:[#allocation0 + $0x78] sm:$0x8] %vm31_vm1, %v594_v17  }
  0xe7   :  { %605 = vst.msk [vmem:[#allocation0 + $0x97] sm:$0x10] %vm31_vm1, %v594_v17   ;;  %607 = vst.msk [vmem:[#allocation0 + $0xb6] sm:$0x20] %vm31_vm1, %v594_v17  }
  0xe8   :  { %609 = vst.msk [vmem:[#allocation0 + $0xd5] sm:$0x40] %vm31_vm1, %v594_v17   ;;  %611 = vst.msk [vmem:[#allocation0 + $0xf4] sm:$0x80] %vm31_vm1, %v594_v17  }
  0xea   :  { %v835_v18 = vld [vmem:[#allocation0 + $0x118] sm:$0xf] }
  0xeb   :  { %v859_v19 = vld [vmem:[#allocation0 + $0x138] sm:$0xf]  ;;  %1001 = vst [vmem:[%s1427_s1 + $0x8c] sm:$0xf] %v835_v18 }
  0xec   :  { %v883_v20 = vld [vmem:[#allocation0 + $0x158] sm:$0xf]  ;;  %1005 = vst [vmem:[%s1427_s1 + $0x9c] sm:$0xf] %v859_v19 }
  0xed   :  { %1009 = vst [vmem:[%s1427_s1 + $0xac] sm:$0xf] %v883_v20  ;;  %v907_v21 = vld [vmem:[#allocation0 + $0x178] sm:$0xf] }
  0xee   :  { %v643_v22 = vld [vmem:[#allocation0 + $0x18] sm:$0xf]  ;;  %1013 = vst [vmem:[%s1427_s1 + $0xbc] sm:$0xf] %v907_v21 }
  0xef   :  { %v667_v23 = vld [vmem:[#allocation0 + $0x38] sm:$0xf]  ;;  %969 = vst [vmem:[%s1427_s1 + $0xc] sm:$0xf] %v643_v22 }
  0xf0   :  { %973 = vst [vmem:[%s1427_s1 + $0x1c] sm:$0xf] %v667_v23  ;;  %v691_v24 = vld [vmem:[#allocation0 + $0x58] sm:$0xf] }
  0xf1   :  { %v715_v25 = vld [vmem:[#allocation0 + $0x78] sm:$0xf]  ;;  %977 = vst [vmem:[%s1427_s1 + $0x2c] sm:$0xf] %v691_v24 }
  0xf2   :  { %v739_v26 = vld [vmem:[#allocation0 + $0x98] sm:$0xf]  ;;  %981 = vst [vmem:[%s1427_s1 + $0x3c] sm:$0xf] %v715_v25 }
  0xf3   :  { %985 = vst [vmem:[%s1427_s1 + $0x4c] sm:$0xf] %v739_v26  ;;  %v763_v27 = vld [vmem:[#allocation0 + $0xb8] sm:$0xf] }
  0xf4   :  { %v787_v28 = vld [vmem:[#allocation0 + $0xd8] sm:$0xf]  ;;  %989 = vst [vmem:[%s1427_s1 + $0x5c] sm:$0xf] %v763_v27 }
  0xf5   :  { %v811_v29 = vld [vmem:[#allocation0 + $0xf8] sm:$0xf]  ;;  %993 = vst [vmem:[%s1427_s1 + $0x6c] sm:$0xf] %v787_v28 }
  0xf6   :  { %997 = vst [vmem:[%s1427_s1 + $0x7c] sm:$0xf] %v811_v29 }

// kernel: factorized_spectral_conv3d_forward.1
= control target key start
LH: loop header
LB: loop body
LE: loop exit
PB: predicated region body
PF: predicated region fallthrough
CT: control target
= control target key end

     0   :  { %v18_v0 = vlaneseq  ;;  %s701_s0 = inlined_call_operand.vmem [shape: f32[1,2,4,2,256], index: 0, kind: input, shape index: {}]   ;;  %s702_s1 = inlined_call_operand.vmem [shape: f32[1,2,4,8,256], index: 1, kind: input, shape index: {}]   ;;  %s703_s2 = inlined_call_operand.vmem [shape: f32[1,2,2,8,256], index: 2, kind: output, shape index: {}]  }
   0x1   :  { %v16_v1 = vld [vmem:[%s701_s0] ss:$2 sm:$0x3]  ;;  %v393_v3 = vld [vmem:[%s701_s0 + $0x10] ss:$2 sm:$0x3] }
   0x2   :  { %v19_v2 = vshrl.u32 %v18_v0, 7  ;;  %v400_v4 = vld [vmem:[%s701_s0 + $0x4] ss:$2 sm:$0x3]  ;;  %v471_v10 = vld [vmem:[%s702_s1 + $0x10] sm:$0xff]  ;;  %v516_v32 = vld [vmem:[%s702_s1 + $0x8] sm:$0xff] }
   0x3   :  { %v401_v5 = vld [vmem:[%s701_s0 + $0x14] ss:$2 sm:$0x3]  ;;  %v456_v6 = vld [vmem:[%s702_s1] sm:$0xff]  ;;  %v521_v33 = vld [vmem:[%s702_s1 + $0x48] sm:$0xff] }
   0x4   :  { %v461_v7 = vld [vmem:[%s702_s1 + $0x40] sm:$0xff]  ;;  %v463_v8 = vsub.s32 0, %v19_v2  ;;  %v408_v9 = vld [vmem:[%s701_s0 + $0x8] ss:$2 sm:$0x3]  ;;  %v481_v13 = vsub.s32 1, %v19_v2 }
   0x5   :  { %v476_v11 = vld [vmem:[%s702_s1 + $0x20] sm:$0xff]  ;;  %v409_v12 = vld [vmem:[%s701_s0 + $0x18] ss:$2 sm:$0x3]  ;;  %v500_v24 = vld [vmem:[%s702_s1 + $0x50] sm:$0xff] }
   0x6   :  { %v21_v14 = vrot.slane %v16_v1, %v463_v8  ;;  %v34_v15 = vrot.slane %v393_v3, %v463_v8  ;;  %v111_v16 = vrot.slane %v400_v4, %v463_v8  ;;  %v124_v17 = vrot.slane %v401_v5, %v463_v8  ;;  %v416_v18 = vld [vmem:[%s701_s0 + $0xc] ss:$2 sm:$0x3]  ;;  %v417_v19 = vld [vmem:[%s701_s0 + $0x1c] ss:$2 sm:$0x3] }
   0x7   :  { %v201_v20 = vrot.slane %v408_v9, %v463_v8  ;;  %v214_v21 = vrot.slane %v409_v12, %v463_v8  ;;  %v506_v26 = vld [vmem:[%s702_s1 + $0x60] sm:$0xff]  ;;  %v291_v27 = vrot.slane %v416_v18, %v463_v8  ;;  %v304_v31 = vrot.slane %v417_v19, %v463_v8  ;;  %v526_v34 = vld [vmem:[%s702_s1 + $0x18] sm:$0xff]  ;;  %v531_v36 = vld [vmem:[%s702_s1 + $0x30] sm:$0xff] }
   0x8   :  { %v41_v22 = vmul.f32 %v21_v14, %v456_v6  ;;  %v45_v23 = vmul.f32 %v461_v7, %v34_v15  ;;  %v131_v25 = vmul.f32 %v471_v10, %v111_v16  ;;  %v135_v28 = vmul.f32 %v500_v24, %v124_v17  ;;  %v540_v41 = vld [vmem:[%s702_s1 + $0x28] sm:$0xff]  ;;  %v550_v46 = vld [vmem:[%s702_s1 + $0x70] sm:$0xff]  ;;  %v557_v49 = vld [vmem:[%s702_s1 + $0x58] sm:$0xff] }
   0x9   :  { %v221_v29 = vmul.f32 %v476_v11, %v201_v20  ;;  %v225_v30 = vmul.f32 %v506_v26, %v214_v21  ;;  %v25_v37 = vrot.slane %v16_v1, %v481_v13  ;;  %v38_v38 = vrot.slane %v393_v3, %v481_v13  ;;  %v563_v51 = vld [vmem:[%s702_s1 + $0x38] sm:$0xff]  ;;  %v574_v58 = vld [vmem:[%s702_s1 + $0x68] sm:$0xff] }
   0xa   :  { %v47_v35 = vsub.f32 %v41_v22, %v45_v23  ;;  %v115_v39 = vrot.slane %v400_v4, %v481_v13  ;;  %v128_v40 = vrot.slane %v401_v5, %v481_v13  ;;  %v205_v42 = vrot.slane %v408_v9, %v481_v13  ;;  %v582_v62 = vld [vmem:[%s702_s1 + $0x78] sm:$0xff]  ;;  %v394_v23 = vld [vmem:[%s701_s0 + $0x1] ss:$2 sm:$0x3] }
   0xb   :  { %v218_v43 = vrot.slane %v409_v12, %v481_v13  ;;  %v545_v44 = vrot.slane %v416_v18, %v481_v13  ;;  %v42_v47 = vmul.f32 %v25_v37, %v516_v32  ;;  %v46_v48 = vmul.f32 %v521_v33, %v38_v38 }
   0xc   :  { %v133_v45 = vadd.f32 %v131_v25, %v47_v35  ;;  %v132_v50 = vmul.f32 %v526_v34, %v115_v39  ;;  %v311_v52 = vmul.f32 %v531_v36, %v291_v27  ;;  %v315_v53 = vmul.f32 %v550_v46, %v304_v31 }
   0xd   :  { %v136_v54 = vmul.f32 %v557_v49, %v128_v40  ;;  %v569_v55 = vrot.slane %v417_v19, %v481_v13  ;;  %v48_v57 = vsub.f32 %v42_v47, %v46_v48  ;;  %v222_v59 = vmul.f32 %v540_v41, %v205_v42  ;;  %v410_v47 = vld [vmem:[%s701_s0 + $0x9] ss:$2 sm:$0x3] }
   0xe   :  { %v137_v56 = vsub.f32 %v133_v45, %v135_v28  ;;  %v49_v60 = vmul.f32 %v461_v7, %v21_v14  ;;  %v226_v61 = vmul.f32 %v574_v58, %v218_v43  ;;  %v312_v63 = vmul.f32 %v563_v51, %v545_v44 }
   0xf   :  { %v53_v0 = vmul.f32 %v34_v15, %v456_v6  ;;  %v139_v1 = vmul.f32 %v500_v24, %v111_v16  ;;  %v134_v3 = vadd.f32 %v132_v50, %v48_v57  ;;  %v316_v4 = vmul.f32 %v582_v62, %v569_v55 }
  0x10   :  { %v223_v2 = vadd.f32 %v221_v29, %v137_v56  ;;  %v143_v5 = vmul.f32 %v471_v10, %v124_v17  ;;  %v229_v12 = vmul.f32 %v506_v26, %v201_v20  ;;  %v233_v14 = vmul.f32 %v476_v11, %v214_v21  ;;  %v395_v17 = vld [vmem:[%s701_s0 + $0x11] ss:$2 sm:$0x3]  ;;  %v402_v29 = vld [vmem:[%s701_s0 + $0x5] ss:$2 sm:$0x3] }
  0x11   :  { %v55_v9 = vadd.f32 %v53_v0, %v49_v60  ;;  %v50_v18 = vmul.f32 %v521_v33, %v25_v37  ;;  %v138_v22 = vsub.f32 %v134_v3, %v136_v54  ;;  %v54_v15 = vmul.f32 %v38_v38, %v516_v32  ;;  %v411_v54 = vld [vmem:[%s701_s0 + $0x19] ss:$2 sm:$0x3] }
  0x12   :  { %v227_v19 = vsub.f32 %v223_v2, %v225_v30  ;;  %v140_v16 = vmul.f32 %v557_v49, %v115_v39  ;;  %v319_v20 = vmul.f32 %v550_v46, %v291_v27  ;;  %v323_v21 = vmul.f32 %v531_v36, %v304_v31  ;;  %v403_v39 = vld [vmem:[%s701_s0 + $0x15] ss:$2 sm:$0x3] }
  0x13   :  { %v141_v25 = vadd.f32 %v139_v1, %v55_v9  ;;  %v144_v28 = vmul.f32 %v526_v34, %v128_v40  ;;  %v224_v35 = vadd.f32 %v222_v59, %v138_v22  ;;  %v56_v37 = vadd.f32 %v54_v15, %v50_v18  ;;  %v418_v1 = vld [vmem:[%s701_s0 + $0xd] ss:$2 sm:$0x3]  ;;  %v419_v22 = vld [vmem:[%s701_s0 + $0x1d] ss:$2 sm:$0x3] }
  0x14   :  { %v313_v30 = vadd.f32 %v311_v52, %v227_v19  ;;  %v230_v38 = vmul.f32 %v574_v58, %v205_v42  ;;  %v234_v27 = vmul.f32 %v540_v41, %v218_v43  ;;  %v63_v31 = vrot.slane %v394_v23, %v463_v8 }
  0x15   :  { %v145_v45 = vadd.f32 %v143_v5, %v141_v25  ;;  %v76_v40 = vrot.slane %v395_v17, %v463_v8  ;;  %v228_v50 = vsub.f32 %v224_v35, %v226_v61  ;;  %v142_v52 = vadd.f32 %v140_v16, %v56_v37 }
  0x16   :  { %v317_v48 = vsub.f32 %v313_v30, %v315_v53  ;;  %v153_v42 = vrot.slane %v402_v29, %v463_v8  ;;  %v83_v43 = vmul.f32 %v63_v31, %v456_v6  ;;  %v166_v59 = vrot.slane %v403_v39, %v463_v8 }
  0x17   :  { %v231_v56 = vadd.f32 %v229_v12, %v145_v45  ;;  %v87_v57 = vmul.f32 %v461_v7, %v76_v40  ;;  %v314_v53 = vadd.f32 %v312_v63, %v228_v50  ;;  %v146_v60 = vadd.f32 %v144_v28, %v142_v52 }
  0x18   :  { %369 = vst [vmem:[%s703_s2] sm:$0xff] %v317_v48  ;;  %v173_v61 = vmul.f32 %v471_v10, %v153_v42  ;;  %v243_v0 = vrot.slane %v410_v47, %v463_v8  ;;  %v177_v5 = vmul.f32 %v500_v24, %v166_v59  ;;  %v256_v9 = vrot.slane %v411_v54, %v463_v8 }
  0x19   :  { %v235_v2 = vadd.f32 %v233_v14, %v231_v56  ;;  %v89_v3 = vsub.f32 %v83_v43, %v87_v57  ;;  %v318_v12 = vsub.f32 %v314_v53, %v316_v4  ;;  %v232_v18 = vadd.f32 %v230_v38, %v146_v60 }
  0x1a   :  { %v320_v63 = vmul.f32 %v582_v62, %v545_v44  ;;  %v324_v19 = vmul.f32 %v563_v51, %v569_v55  ;;  %v263_v14 = vmul.f32 %v476_v11, %v243_v0  ;;  %v333_v25 = vrot.slane %v418_v1, %v463_v8 }
  0x1b   :  { %v321_v15 = vadd.f32 %v319_v20, %v235_v2  ;;  %v175_v16 = vadd.f32 %v173_v61, %v89_v3  ;;  %370 = vst [vmem:[%s703_s2 + $0x8] sm:$0xff] %v318_v12  ;;  %v236_v4 = vadd.f32 %v234_v27, %v232_v18  ;;  %v267_v44 = vmul.f32 %v506_v26, %v256_v9 }
  0x1c   :  { %v67_v28 = vrot.slane %v394_v23, %v481_v13  ;;  %v80_v55 = vrot.slane %v395_v17, %v481_v13  ;;  %v346_v20 = vrot.slane %v419_v22, %v463_v8  ;;  %v157_v37 = vrot.slane %v402_v29, %v481_v13 }
  0x1d   :  { %v325_v30 = vadd.f32 %v323_v21, %v321_v15  ;;  %v179_v35 = vsub.f32 %v175_v16, %v177_v5  ;;  %v322_v38 = vadd.f32 %v320_v63, %v236_v4  ;;  %v170_v50 = vrot.slane %v403_v39, %v481_v13 }
  0x1e   :  { %v84_v45 = vmul.f32 %v67_v28, %v516_v32  ;;  %v88_v48 = vmul.f32 %v521_v33, %v80_v55  ;;  %v353_v17 = vmul.f32 %v531_v36, %v333_v25  ;;  %v174_v21 = vmul.f32 %v526_v34, %v157_v37 }
  0x1f   :  { %420 = vst [vmem:[%s703_s2 + $0x20] sm:$0xff] %v325_v30  ;;  %v265_v23 = vadd.f32 %v263_v14, %v179_v35  ;;  %v247_v8 = vrot.slane %v410_v47, %v481_v13  ;;  %v326_v27 = vadd.f32 %v324_v19, %v322_v38  ;;  %v178_v52 = vmul.f32 %v557_v49, %v170_v50 }
  0x20   :  { %v90_v29 = vsub.f32 %v84_v45, %v88_v48  ;;  %v260_v56 = vrot.slane %v411_v54, %v481_v13  ;;  %v357_v39 = vmul.f32 %v550_v46, %v346_v20  ;;  %v337_v57 = vrot.slane %v418_v1, %v481_v13 }
  0x21   :  { %v269_v43 = vsub.f32 %v265_v23, %v267_v44  ;;  %421 = vst [vmem:[%s703_s2 + $0x28] sm:$0xff] %v326_v27  ;;  %v264_v60 = vmul.f32 %v540_v41, %v247_v8  ;;  %v91_v47 = vmul.f32 %v461_v7, %v63_v31  ;;  %v95_v61 = vmul.f32 %v76_v40, %v456_v6 }
  0x22   :  { %v176_v53 = vadd.f32 %v174_v21, %v90_v29  ;;  %v350_v3 = vrot.slane %v419_v22, %v481_v13  ;;  %v181_v54 = vmul.f32 %v500_v24, %v153_v42  ;;  %v268_v12 = vmul.f32 %v574_v58, %v260_v56 }
  0x23   :  { %v355_v2 = vadd.f32 %v353_v17, %v269_v43  ;;  %v97_v1 = vadd.f32 %v95_v61, %v91_v47  ;;  %v185_v18 = vmul.f32 %v471_v10, %v166_v59  ;;  %v354_v19 = vmul.f32 %v563_v51, %v337_v57 }
  0x24   :  { %v180_v5 = vsub.f32 %v176_v53, %v178_v52  ;;  %v271_v15 = vmul.f32 %v506_v26, %v243_v0  ;;  %v92_v7 = vmul.f32 %v521_v33, %v67_v28  ;;  %v96_v40 = vmul.f32 %v80_v55, %v516_v32 }
  0x25   :  { %v359_v63 = vsub.f32 %v355_v2, %v357_v39  ;;  %v183_v6 = vadd.f32 %v181_v54, %v97_v1  ;;  %v182_v13 = vmul.f32 %v557_v49, %v157_v37  ;;  %v358_v24 = vmul.f32 %v582_v62, %v350_v3 }
  0x26   :  { %v266_v31 = vadd.f32 %v264_v60, %v180_v5  ;;  %v275_v10 = vmul.f32 %v476_v11, %v256_v9  ;;  %v98_v22 = vadd.f32 %v96_v40, %v92_v7  ;;  %v186_v26 = vmul.f32 %v526_v34, %v170_v50 }
  0x27   :  { %422 = vst [vmem:[%s703_s2 + $0x10] sm:$0xff] %v359_v63  ;;  %v187_v59 = vadd.f32 %v185_v18, %v183_v6  ;;  %v361_v33 = vmul.f32 %v550_v46, %v333_v25  ;;  %v272_v49 = vmul.f32 %v574_v58, %v247_v8  ;;  %v365_v14 = vmul.f32 %v531_v36, %v346_v20 }
  0x28   :  { %v270_v42 = vsub.f32 %v266_v31, %v268_v12  ;;  %v184_v32 = vadd.f32 %v182_v13, %v98_v22  ;;  %v276_v55 = vmul.f32 %v540_v41, %v260_v56  ;;  %v362_v46 = vmul.f32 %v582_v62, %v337_v57 }
  0x29   :  { %v273_v16 = vadd.f32 %v271_v15, %v187_v59  ;;  %v366_v30 = vmul.f32 %v563_v51, %v350_v3 }
  0x2a   :  { %v356_v0 = vadd.f32 %v354_v19, %v270_v42  ;;  %v188_v28 = vadd.f32 %v186_v26, %v184_v32 }
  0x2b   :  { %v277_v44 = vadd.f32 %v275_v10, %v273_v16 }
  0x2c   :  { %v360_v4 = vsub.f32 %v356_v0, %v358_v24  ;;  %v274_v34 = vadd.f32 %v272_v49, %v188_v28 }
  0x2d   :  { %v363_v11 = vadd.f32 %v361_v33, %v277_v44 }
  0x2e   :  { %423 = vst [vmem:[%s703_s2 + $0x18] sm:$0xff] %v360_v4  ;;  %v278_v25 = vadd.f32 %v276_v55, %v274_v34 }
  0x2f   :  { %v367_v9 = vadd.f32 %v365_v14, %v363_v11 }
  0x30   :  { %v364_v36 = vadd.f32 %v362_v46, %v278_v25 }
  0x31   :  { %424 = vst [vmem:[%s703_s2 + $0x30] sm:$0xff] %v367_v9 }
  0x32   :  { %v368_v58 = vadd.f32 %v366_v30, %v364_v36 }
  0x34   :  { %425 = vst [vmem:[%s703_s2 + $0x38] sm:$0xff] %v368_v58 }

// kernel: reverse.1
= control target key start
LH: loop header
LB: loop body
LE: loop exit
PB: predicated region body
PF: predicated region fallthrough
CT: control target
= control target key end

     0   :  { %s2024_s0 = inlined_call_operand.vmem [shape: f32[2,6,16,16,7], index: 0, kind: input, shape index: {}]   ;;  %s2025_s1 = inlined_call_operand.vmem [shape: f32[2,6,16,16,7], index: 1, kind: output, shape index: {}]  }
   0x1   :  { %v672_v0 = vld [vmem:[%s2024_s0 + $0x60] sm:$0xff]  ;;  %v675_v2 = vld [vmem:[%s2024_s0 + $0xd0] sm:$0xff] }
   0x2   :  { %v673_v1 = vld [vmem:[%s2024_s0 + $0x300] sm:$0xff]  ;;  %4 = vst [vmem:[%s2025_s1] sm:$0xff] %v672_v0  ;;  %676 = vst [vmem:[%s2025_s1 + $0x70] sm:$0xff] %v675_v2  ;;  %v677_v3 = vld [vmem:[%s2024_s0 + $0x370] sm:$0xff] }
   0x3   :  { %674 = vst [vmem:[%s2025_s1 + $0x2a0] sm:$0xff] %v673_v1  ;;  %v679_v4 = vld [vmem:[%s2024_s0 + $0x140] sm:$0xff]  ;;  %678 = vst [vmem:[%s2025_s1 + $0x310] sm:$0xff] %v677_v3  ;;  %v683_v6 = vld [vmem:[%s2024_s0 + $0x1b0] sm:$0xff] }
   0x4   :  { %v681_v5 = vld [vmem:[%s2024_s0 + $0x3e0] sm:$0xff]  ;;  %680 = vst [vmem:[%s2025_s1 + $0xe0] sm:$0xff] %v679_v4  ;;  %v685_v7 = vld [vmem:[%s2024_s0 + $0x450] sm:$0xff]  ;;  %684 = vst [vmem:[%s2025_s1 + $0x150] sm:$0xff] %v683_v6 }
   0x5   :  { %682 = vst [vmem:[%s2025_s1 + $0x380] sm:$0xff] %v681_v5  ;;  %v687_v8 = vld [vmem:[%s2024_s0 + $0x220] sm:$0xff]  ;;  %686 = vst [vmem:[%s2025_s1 + $0x3f0] sm:$0xff] %v685_v7  ;;  %v691_v10 = vld [vmem:[%s2024_s0 + $0x290] sm:$0xff] }
   0x6   :  { %688 = vst [vmem:[%s2025_s1 + $0x1c0] sm:$0xff] %v687_v8  ;;  %v689_v9 = vld [vmem:[%s2024_s0 + $0x4c0] sm:$0xff]  ;;  %v693_v11 = vld [vmem:[%s2024_s0 + $0x530] sm:$0xff]  ;;  %692 = vst [vmem:[%s2025_s1 + $0x230] sm:$0xff] %v691_v10 }
   0x7   :  { %690 = vst [vmem:[%s2025_s1 + $0x460] sm:$0xff] %v689_v9  ;;  %694 = vst [vmem:[%s2025_s1 + $0x4d0] sm:$0xff] %v693_v11  ;;  %v695_v12 = vld [vmem:[%s2024_s0 + $0x50] sm:$0xff]  ;;  %v699_v14 = vld [vmem:[%s2024_s0 + $0xc0] sm:$0xff] }
   0x8   :  { %v697_v13 = vld [vmem:[%s2024_s0 + $0x2f0] sm:$0xff]  ;;  %696 = vst [vmem:[%s2025_s1 + $0x10] sm:$0xff] %v695_v12  ;;  %700 = vst [vmem:[%s2025_s1 + $0x80] sm:$0xff] %v699_v14  ;;  %v701_v15 = vld [vmem:[%s2024_s0 + $0x360] sm:$0xff] }
   0x9   :  { %698 = vst [vmem:[%s2025_s1 + $0x2b0] sm:$0xff] %v697_v13  ;;  %v703_v16 = vld [vmem:[%s2024_s0 + $0x130] sm:$0xff]  ;;  %702 = vst [vmem:[%s2025_s1 + $0x320] sm:$0xff] %v701_v15  ;;  %v707_v18 = vld [vmem:[%s2024_s0 + $0x1a0] sm:$0xff] }
   0xa   :  { %v705_v17 = vld [vmem:[%s2024_s0 + $0x3d0] sm:$0xff]  ;;  %704 = vst [vmem:[%s2025_s1 + $0xf0] sm:$0xff] %v703_v16  ;;  %v709_v19 = vld [vmem:[%s2024_s0 + $0x440] sm:$0xff]  ;;  %708 = vst [vmem:[%s2025_s1 + $0x160] sm:$0xff] %v707_v18 }
   0xb   :  { %706 = vst [vmem:[%s2025_s1 + $0x390] sm:$0xff] %v705_v17  ;;  %v711_v20 = vld [vmem:[%s2024_s0 + $0x210] sm:$0xff]  ;;  %710 = vst [vmem:[%s2025_s1 + $0x400] sm:$0xff] %v709_v19  ;;  %v715_v22 = vld [vmem:[%s2024_s0 + $0x280] sm:$0xff] }
   0xc   :  { %712 = vst [vmem:[%s2025_s1 + $0x1d0] sm:$0xff] %v711_v20  ;;  %v713_v21 = vld [vmem:[%s2024_s0 + $0x4b0] sm:$0xff]  ;;  %v717_v23 = vld [vmem:[%s2024_s0 + $0x520] sm:$0xff]  ;;  %716 = vst [vmem:[%s2025_s1 + $0x240] sm:$0xff] %v715_v22 }
   0xd   :  { %714 = vst [vmem:[%s2025_s1 + $0x470] sm:$0xff] %v713_v21  ;;  %718 = vst [vmem:[%s2025_s1 + $0x4e0] sm:$0xff] %v717_v23  ;;  %v719_v24 = vld [vmem:[%s2024_s0 + $0x40] sm:$0xff]  ;;  %v723_v26 = vld [vmem:[%s2024_s0 + $0xb0] sm:$0xff] }
   0xe   :  { %v721_v25 = vld [vmem:[%s2024_s0 + $0x2e0] sm:$0xff]  ;;  %720 = vst [vmem:[%s2025_s1 + $0x20] sm:$0xff] %v719_v24  ;;  %724 = vst [vmem:[%s2025_s1 + $0x90] sm:$0xff] %v723_v26  ;;  %v725_v27 = vld [vmem:[%s2024_s0 + $0x350] sm:$0xff] }
   0xf   :  { %722 = vst [vmem:[%s2025_s1 + $0x2c0] sm:$0xff] %v721_v25  ;;  %v727_v28 = vld [vmem:[%s2024_s0 + $0x120] sm:$0xff]  ;;  %726 = vst [vmem:[%s2025_s1 + $0x330] sm:$0xff] %v725_v27  ;;  %v731_v30 = vld [vmem:[%s2024_s0 + $0x190] sm:$0xff] }
  0x10   :  { %v729_v29 = vld [vmem:[%s2024_s0 + $0x3c0] sm:$0xff]  ;;  %728 = vst [vmem:[%s2025_s1 + $0x100] sm:$0xff] %v727_v28  ;;  %v733_v31 = vld [vmem:[%s2024_s0 + $0x430] sm:$0xff]  ;;  %732 = vst [vmem:[%s2025_s1 + $0x170] sm:$0xff] %v731_v30 }
  0x11   :  { %730 = vst [vmem:[%s2025_s1 + $0x3a0] sm:$0xff] %v729_v29  ;;  %v735_v32 = vld [vmem:[%s2024_s0 + $0x200] sm:$0xff]  ;;  %734 = vst [vmem:[%s2025_s1 + $0x410] sm:$0xff] %v733_v31  ;;  %v739_v34 = vld [vmem:[%s2024_s0 + $0x270] sm:$0xff] }
  0x12   :  { %736 = vst [vmem:[%s2025_s1 + $0x1e0] sm:$0xff] %v735_v32  ;;  %v737_v33 = vld [vmem:[%s2024_s0 + $0x4a0] sm:$0xff]  ;;  %v741_v35 = vld [vmem:[%s2024_s0 + $0x510] sm:$0xff]  ;;  %740 = vst [vmem:[%s2025_s1 + $0x250] sm:$0xff] %v739_v34 }
  0x13   :  { %738 = vst [vmem:[%s2025_s1 + $0x480] sm:$0xff] %v737_v33  ;;  %742 = vst [vmem:[%s2025_s1 + $0x4f0] sm:$0xff] %v741_v35  ;;  %v743_v36 = vld [vmem:[%s2024_s0 + $0x30] sm:$0xff]  ;;  %v747_v38 = vld [vmem:[%s2024_s0 + $0xa0] sm:$0xff] }
  0x14   :  { %v745_v37 = vld [vmem:[%s2024_s0 + $0x2d0] sm:$0xff]  ;;  %744 = vst [vmem:[%s2025_s1 + $0x30] sm:$0xff] %v743_v36  ;;  %748 = vst [vmem:[%s2025_s1 + $0xa0] sm:$0xff] %v747_v38  ;;  %v749_v39 = vld [vmem:[%s2024_s0 + $0x340] sm:$0xff] }
  0x15   :  { %746 = vst [vmem:[%s2025_s1 + $0x2d0] sm:$0xff] %v745_v37  ;;  %v751_v40 = vld [vmem:[%s2024_s0 + $0x110] sm:$0xff]  ;;  %750 = vst [vmem:[%s2025_s1 + $0x340] sm:$0xff] %v749_v39  ;;  %v755_v42 = vld [vmem:[%s2024_s0 + $0x180] sm:$0xff] }
  0x16   :  { %v753_v41 = vld [vmem:[%s2024_s0 + $0x3b0] sm:$0xff]  ;;  %752 = vst [vmem:[%s2025_s1 + $0x110] sm:$0xff] %v751_v40  ;;  %v757_v43 = vld [vmem:[%s2024_s0 + $0x420] sm:$0xff]  ;;  %756 = vst [vmem:[%s2025_s1 + $0x180] sm:$0xff] %v755_v42 }
  0x17   :  { %754 = vst [vmem:[%s2025_s1 + $0x3b0] sm:$0xff] %v753_v41  ;;  %v759_v44 = vld [vmem:[%s2024_s0 + $0x1f0] sm:$0xff]  ;;  %758 = vst [vmem:[%s2025_s1 + $0x420] sm:$0xff] %v757_v43  ;;  %v763_v46 = vld [vmem:[%s2024_s0 + $0x260] sm:$0xff] }
  0x18   :  { %760 = vst [vmem:[%s2025_s1 + $0x1f0] sm:$0xff] %v759_v44  ;;  %v761_v45 = vld [vmem:[%s2024_s0 + $0x490] sm:$0xff]  ;;  %v765_v47 = vld [vmem:[%s2024_s0 + $0x500] sm:$0xff]  ;;  %764 = vst [vmem:[%s2025_s1 + $0x260] sm:$0xff] %v763_v46 }
  0x19   :  { %762 = vst [vmem:[%s2025_s1 + $0x490] sm:$0xff] %v761_v45  ;;  %766 = vst [vmem:[%s2025_s1 + $0x500] sm:$0xff] %v765_v47  ;;  %v767_v48 = vld [vmem:[%s2024_s0 + $0x20] sm:$0xff]  ;;  %v771_v50 = vld [vmem:[%s2024_s0 + $0x90] sm:$0xff] }
  0x1a   :  { %v769_v49 = vld [vmem:[%s2024_s0 + $0x2c0] sm:$0xff]  ;;  %768 = vst [vmem:[%s2025_s1 + $0x40] sm:$0xff] %v767_v48  ;;  %772 = vst [vmem:[%s2025_s1 + $0xb0] sm:$0xff] %v771_v50  ;;  %v773_v51 = vld [vmem:[%s2024_s0 + $0x330] sm:$0xff] }
  0x1b   :  { %770 = vst [vmem:[%s2025_s1 + $0x2e0] sm:$0xff] %v769_v49  ;;  %v775_v52 = vld [vmem:[%s2024_s0 + $0x100] sm:$0xff]  ;;  %774 = vst [vmem:[%s2025_s1 + $0x350] sm:$0xff] %v773_v51  ;;  %v779_v54 = vld [vmem:[%s2024_s0 + $0x170] sm:$0xff] }
  0x1c   :  { %v777_v53 = vld [vmem:[%s2024_s0 + $0x3a0] sm:$0xff]  ;;  %776 = vst [vmem:[%s2025_s1 + $0x120] sm:$0xff] %v775_v52  ;;  %v781_v55 = vld [vmem:[%s2024_s0 + $0x410] sm:$0xff]  ;;  %780 = vst [vmem:[%s2025_s1 + $0x190] sm:$0xff] %v779_v54 }
  0x1d   :  { %778 = vst [vmem:[%s2025_s1 + $0x3c0] sm:$0xff] %v777_v53  ;;  %v783_v56 = vld [vmem:[%s2024_s0 + $0x1e0] sm:$0xff]  ;;  %782 = vst [vmem:[%s2025_s1 + $0x430] sm:$0xff] %v781_v55  ;;  %v787_v58 = vld [vmem:[%s2024_s0 + $0x250] sm:$0xff] }
  0x1e   :  { %784 = vst [vmem:[%s2025_s1 + $0x200] sm:$0xff] %v783_v56  ;;  %v785_v57 = vld [vmem:[%s2024_s0 + $0x480] sm:$0xff]  ;;  %v789_v59 = vld [vmem:[%s2024_s0 + $0x4f0] sm:$0xff]  ;;  %788 = vst [vmem:[%s2025_s1 + $0x270] sm:$0xff] %v787_v58 }
  0x1f   :  { %786 = vst [vmem:[%s2025_s1 + $0x4a0] sm:$0xff] %v785_v57  ;;  %790 = vst [vmem:[%s2025_s1 + $0x510] sm:$0xff] %v789_v59  ;;  %v791_v60 = vld [vmem:[%s2024_s0 + $0x10] sm:$0xff]  ;;  %v795_v62 = vld [vmem:[%s2024_s0 + $0x80] sm:$0xff] }
  0x20   :  { %v793_v61 = vld [vmem:[%s2024_s0 + $0x2b0] sm:$0xff]  ;;  %792 = vst [vmem:[%s2025_s1 + $0x50] sm:$0xff] %v791_v60  ;;  %796 = vst [vmem:[%s2025_s1 + $0xc0] sm:$0xff] %v795_v62  ;;  %v797_v63 = vld [vmem:[%s2024_s0 + $0x320] sm:$0xff] }
  0x21   :  { %794 = vst [vmem:[%s2025_s1 + $0x2f0] sm:$0xff] %v793_v61  ;;  %v799_v0 = vld [vmem:[%s2024_s0 + $0xf0] sm:$0xff]  ;;  %798 = vst [vmem:[%s2025_s1 + $0x360] sm:$0xff] %v797_v63  ;;  %v803_v2 = vld [vmem:[%s2024_s0 + $0x160] sm:$0xff] }
  0x22   :  { %v801_v1 = vld [vmem:[%s2024_s0 + $0x390] sm:$0xff]  ;;  %800 = vst [vmem:[%s2025_s1 + $0x130] sm:$0xff] %v799_v0  ;;  %v805_v3 = vld [vmem:[%s2024_s0 + $0x400] sm:$0xff]  ;;  %804 = vst [vmem:[%s2025_s1 + $0x1a0] sm:$0xff] %v803_v2 }
  0x23   :  { %802 = vst [vmem:[%s2025_s1 + $0x3d0] sm:$0xff] %v801_v1  ;;  %v807_v4 = vld [vmem:[%s2024_s0 + $0x1d0] sm:$0xff]  ;;  %806 = vst [vmem:[%s2025_s1 + $0x440] sm:$0xff] %v805_v3  ;;  %v811_v6 = vld [vmem:[%s2024_s0 + $0x240] sm:$0xff] }
  0x24   :  { %808 = vst [vmem:[%s2025_s1 + $0x210] sm:$0xff] %v807_v4  ;;  %v809_v5 = vld [vmem:[%s2024_s0 + $0x470] sm:$0xff]  ;;  %v813_v7 = vld [vmem:[%s2024_s0 + $0x4e0] sm:$0xff]  ;;  %812 = vst [vmem:[%s2025_s1 + $0x280] sm:$0xff] %v811_v6 }
  0x25   :  { %810 = vst [vmem:[%s2025_s1 + $0x4b0] sm:$0xff] %v809_v5  ;;  %814 = vst [vmem:[%s2025_s1 + $0x520] sm:$0xff] %v813_v7  ;;  %v289_v8 = vld [vmem:[%s2024_s0] sm:$0xff]  ;;  %v818_v10 = vld [vmem:[%s2024_s0 + $0x70] sm:$0xff] }
  0x26   :  { %v816_v9 = vld [vmem:[%s2024_s0 + $0x2a0] sm:$0xff]  ;;  %815 = vst [vmem:[%s2025_s1 + $0x60] sm:$0xff] %v289_v8  ;;  %819 = vst [vmem:[%s2025_s1 + $0xd0] sm:$0xff] %v818_v10  ;;  %v820_v11 = vld [vmem:[%s2024_s0 + $0x310] sm:$0xff] }
  0x27   :  { %817 = vst [vmem:[%s2025_s1 + $0x300] sm:$0xff] %v816_v9  ;;  %v822_v12 = vld [vmem:[%s2024_s0 + $0xe0] sm:$0xff]  ;;  %821 = vst [vmem:[%s2025_s1 + $0x370] sm:$0xff] %v820_v11  ;;  %v826_v14 = vld [vmem:[%s2024_s0 + $0x150] sm:$0xff] }
  0x28   :  { %v824_v13 = vld [vmem:[%s2024_s0 + $0x380] sm:$0xff]  ;;  %823 = vst [vmem:[%s2025_s1 + $0x140] sm:$0xff] %v822_v12  ;;  %v828_v15 = vld [vmem:[%s2024_s0 + $0x3f0] sm:$0xff]  ;;  %827 = vst [vmem:[%s2025_s1 + $0x1b0] sm:$0xff] %v826_v14 }
  0x29   :  { %825 = vst [vmem:[%s2025_s1 + $0x3e0] sm:$0xff] %v824_v13  ;;  %v830_v16 = vld [vmem:[%s2024_s0 + $0x1c0] sm:$0xff]  ;;  %829 = vst [vmem:[%s2025_s1 + $0x450] sm:$0xff] %v828_v15  ;;  %v834_v18 = vld [vmem:[%s2024_s0 + $0x230] sm:$0xff] }
  0x2a   :  { %831 = vst [vmem:[%s2025_s1 + $0x220] sm:$0xff] %v830_v16  ;;  %v832_v17 = vld [vmem:[%s2024_s0 + $0x460] sm:$0xff]  ;;  %v836_v19 = vld [vmem:[%s2024_s0 + $0x4d0] sm:$0xff]  ;;  %835 = vst [vmem:[%s2025_s1 + $0x290] sm:$0xff] %v834_v18 }
  0x2b   :  { %833 = vst [vmem:[%s2025_s1 + $0x4c0] sm:$0xff] %v832_v17  ;;  %837 = vst [vmem:[%s2025_s1 + $0x530] sm:$0xff] %v836_v19  ;;  %v838_v20 = vld [vmem:[%s2024_s0 + $0x68] sm:$0xff]  ;;  %v842_v22 = vld [vmem:[%s2024_s0 + $0xd8] sm:$0xff] }
  0x2c   :  { %v840_v21 = vld [vmem:[%s2024_s0 + $0x308] sm:$0xff]  ;;  %839 = vst [vmem:[%s2025_s1 + $0x8] sm:$0xff] %v838_v20  ;;  %843 = vst [vmem:[%s2025_s1 + $0x78] sm:$0xff] %v842_v22  ;;  %v844_v23 = vld [vmem:[%s2024_s0 + $0x378] sm:$0xff] }
  0x2d   :  { %841 = vst [vmem:[%s2025_s1 + $0x2a8] sm:$0xff] %v840_v21  ;;  %v846_v24 = vld [vmem:[%s2024_s0 + $0x148] sm:$0xff]  ;;  %845 = vst [vmem:[%s2025_s1 + $0x318] sm:$0xff] %v844_v23  ;;  %v850_v26 = vld [vmem:[%s2024_s0 + $0x1b8] sm:$0xff] }
  0x2e   :  { %v848_v25 = vld [vmem:[%s2024_s0 + $0x3e8] sm:$0xff]  ;;  %847 = vst [vmem:[%s2025_s1 + $0xe8] sm:$0xff] %v846_v24  ;;  %v852_v27 = vld [vmem:[%s2024_s0 + $0x458] sm:$0xff]  ;;  %851 = vst [vmem:[%s2025_s1 + $0x158] sm:$0xff] %v850_v26 }
  0x2f   :  { %849 = vst [vmem:[%s2025_s1 + $0x388] sm:$0xff] %v848_v25  ;;  %v854_v28 = vld [vmem:[%s2024_s0 + $0x228] sm:$0xff]  ;;  %853 = vst [vmem:[%s2025_s1 + $0x3f8] sm:$0xff] %v852_v27  ;;  %v858_v30 = vld [vmem:[%s2024_s0 + $0x298] sm:$0xff] }
  0x30   :  { %855 = vst [vmem:[%s2025_s1 + $0x1c8] sm:$0xff] %v854_v28  ;;  %v856_v29 = vld [vmem:[%s2024_s0 + $0x4c8] sm:$0xff]  ;;  %v860_v31 = vld [vmem:[%s2024_s0 + $0x538] sm:$0xff]  ;;  %859 = vst [vmem:[%s2025_s1 + $0x238] sm:$0xff] %v858_v30 }
  0x31   :  { %857 = vst [vmem:[%s2025_s1 + $0x468] sm:$0xff] %v856_v29  ;;  %861 = vst [vmem:[%s2025_s1 + $0x4d8] sm:$0xff] %v860_v31  ;;  %v862_v32 = vld [vmem:[%s2024_s0 + $0x58] sm:$0xff]  ;;  %v866_v34 = vld [vmem:[%s2024_s0 + $0xc8] sm:$0xff] }
  0x32   :  { %v864_v33 = vld [vmem:[%s2024_s0 + $0x2f8] sm:$0xff]  ;;  %863 = vst [vmem:[%s2025_s1 + $0x18] sm:$0xff] %v862_v32  ;;  %867 = vst [vmem:[%s2025_s1 + $0x88] sm:$0xff] %v866_v34  ;;  %v868_v35 = vld [vmem:[%s2024_s0 + $0x368] sm:$0xff] }
  0x33   :  { %865 = vst [vmem:[%s2025_s1 + $0x2b8] sm:$0xff] %v864_v33  ;;  %v870_v36 = vld [vmem:[%s2024_s0 + $0x138] sm:$0xff]  ;;  %869 = vst [vmem:[%s2025_s1 + $0x328] sm:$0xff] %v868_v35  ;;  %v874_v38 = vld [vmem:[%s2024_s0 + $0x1a8] sm:$0xff] }
  0x34   :  { %v872_v37 = vld [vmem:[%s2024_s0 + $0x3d8] sm:$0xff]  ;;  %871 = vst [vmem:[%s2025_s1 + $0xf8] sm:$0xff] %v870_v36  ;;  %v876_v39 = vld [vmem:[%s2024_s0 + $0x448] sm:$0xff]  ;;  %875 = vst [vmem:[%s2025_s1 + $0x168] sm:$0xff] %v874_v38 }
  0x35   :  { %873 = vst [vmem:[%s2025_s1 + $0x398] sm:$0xff] %v872_v37  ;;  %v878_v40 = vld [vmem:[%s2024_s0 + $0x218] sm:$0xff]  ;;  %877 = vst [vmem:[%s2025_s1 + $0x408] sm:$0xff] %v876_v39  ;;  %v882_v42 = vld [vmem:[%s2024_s0 + $0x288] sm:$0xff] }
  0x36   :  { %879 = vst [vmem:[%s2025_s1 + $0x1d8] sm:$0xff] %v878_v40  ;;  %v880_v41 = vld [vmem:[%s2024_s0 + $0x4b8] sm:$0xff]  ;;  %v884_v43 = vld [vmem:[%s2024_s0 + $0x528] sm:$0xff]  ;;  %883 = vst [vmem:[%s2025_s1 + $0x248] sm:$0xff] %v882_v42 }
  0x37   :  { %881 = vst [vmem:[%s2025_s1 + $0x478] sm:$0xff] %v880_v41  ;;  %885 = vst [vmem:[%s2025_s1 + $0x4e8] sm:$0xff] %v884_v43  ;;  %v886_v44 = vld [vmem:[%s2024_s0 + $0x48] sm:$0xff]  ;;  %v890_v46 = vld [vmem:[%s2024_s0 + $0xb8] sm:$0xff] }
  0x38   :  { %v888_v45 = vld [vmem:[%s2024_s0 + $0x2e8] sm:$0xff]  ;;  %887 = vst [vmem:[%s2025_s1 + $0x28] sm:$0xff] %v886_v44  ;;  %891 = vst [vmem:[%s2025_s1 + $0x98] sm:$0xff] %v890_v46  ;;  %v892_v47 = vld [vmem:[%s2024_s0 + $0x358] sm:$0xff] }
  0x39   :  { %889 = vst [vmem:[%s2025_s1 + $0x2c8] sm:$0xff] %v888_v45  ;;  %v894_v48 = vld [vmem:[%s2024_s0 + $0x128] sm:$0xff]  ;;  %893 = vst [vmem:[%s2025_s1 + $0x338] sm:$0xff] %v892_v47  ;;  %v898_v50 = vld [vmem:[%s2024_s0 + $0x198] sm:$0xff] }
  0x3a   :  { %v896_v49 = vld [vmem:[%s2024_s0 + $0x3c8] sm:$0xff]  ;;  %895 = vst [vmem:[%s2025_s1 + $0x108] sm:$0xff] %v894_v48  ;;  %v900_v51 = vld [vmem:[%s2024_s0 + $0x438] sm:$0xff]  ;;  %899 = vst [vmem:[%s2025_s1 + $0x178] sm:$0xff] %v898_v50 }
  0x3b   :  { %897 = vst [vmem:[%s2025_s1 + $0x3a8] sm:$0xff] %v896_v49  ;;  %v902_v52 = vld [vmem:[%s2024_s0 + $0x208] sm:$0xff]  ;;  %901 = vst [vmem:[%s2025_s1 + $0x418] sm:$0xff] %v900_v51  ;;  %v906_v54 = vld [vmem:[%s2024_s0 + $0x278] sm:$0xff] }
  0x3c   :  { %903 = vst [vmem:[%s2025_s1 + $0x1e8] sm:$0xff] %v902_v52  ;;  %v904_v53 = vld [vmem:[%s2024_s0 + $0x4a8] sm:$0xff]  ;;  %v908_v55 = vld [vmem:[%s2024_s0 + $0x518] sm:$0xff]  ;;  %907 = vst [vmem:[%s2025_s1 + $0x258] sm:$0xff] %v906_v54 }
  0x3d   :  { %905 = vst [vmem:[%s2025_s1 + $0x488] sm:$0xff] %v904_v53  ;;  %909 = vst [vmem:[%s2025_s1 + $0x4f8] sm:$0xff] %v908_v55  ;;  %v910_v56 = vld [vmem:[%s2024_s0 + $0x38] sm:$0xff]  ;;  %v914_v58 = vld [vmem:[%s2024_s0 + $0xa8] sm:$0xff] }
  0x3e   :  { %v912_v57 = vld [vmem:[%s2024_s0 + $0x2d8] sm:$0xff]  ;;  %911 = vst [vmem:[%s2025_s1 + $0x38] sm:$0xff] %v910_v56  ;;  %915 = vst [vmem:[%s2025_s1 + $0xa8] sm:$0xff] %v914_v58  ;;  %v916_v59 = vld [vmem:[%s2024_s0 + $0x348] sm:$0xff] }
  0x3f   :  { %913 = vst [vmem:[%s2025_s1 + $0x2d8] sm:$0xff] %v912_v57  ;;  %v918_v60 = vld [vmem:[%s2024_s0 + $0x118] sm:$0xff]  ;;  %917 = vst [vmem:[%s2025_s1 + $0x348] sm:$0xff] %v916_v59  ;;  %v922_v62 = vld [vmem:[%s2024_s0 + $0x188] sm:$0xff] }
  0x40   :  { %v920_v61 = vld [vmem:[%s2024_s0 + $0x3b8] sm:$0xff]  ;;  %919 = vst [vmem:[%s2025_s1 + $0x118] sm:$0xff] %v918_v60  ;;  %v924_v63 = vld [vmem:[%s2024_s0 + $0x428] sm:$0xff]  ;;  %923 = vst [vmem:[%s2025_s1 + $0x188] sm:$0xff] %v922_v62 }
  0x41   :  { %921 = vst [vmem:[%s2025_s1 + $0x3b8] sm:$0xff] %v920_v61  ;;  %v926_v0 = vld [vmem:[%s2024_s0 + $0x1f8] sm:$0xff]  ;;  %925 = vst [vmem:[%s2025_s1 + $0x428] sm:$0xff] %v924_v63  ;;  %v930_v2 = vld [vmem:[%s2024_s0 + $0x268] sm:$0xff] }
  0x42   :  { %927 = vst [vmem:[%s2025_s1 + $0x1f8] sm:$0xff] %v926_v0  ;;  %v928_v1 = vld [vmem:[%s2024_s0 + $0x498] sm:$0xff]  ;;  %v932_v3 = vld [vmem:[%s2024_s0 + $0x508] sm:$0xff]  ;;  %931 = vst [vmem:[%s2025_s1 + $0x268] sm:$0xff] %v930_v2 }
  0x43   :  { %929 = vst [vmem:[%s2025_s1 + $0x498] sm:$0xff] %v928_v1  ;;  %933 = vst [vmem:[%s2025_s1 + $0x508] sm:$0xff] %v932_v3  ;;  %v934_v4 = vld [vmem:[%s2024_s0 + $0x28] sm:$0xff]  ;;  %v938_v6 = vld [vmem:[%s2024_s0 + $0x98] sm:$0xff] }
  0x44   :  { %v936_v5 = vld [vmem:[%s2024_s0 + $0x2c8] sm:$0xff]  ;;  %935 = vst [vmem:[%s2025_s1 + $0x48] sm:$0xff] %v934_v4  ;;  %939 = vst [vmem:[%s2025_s1 + $0xb8] sm:$0xff] %v938_v6  ;;  %v940_v7 = vld [vmem:[%s2024_s0 + $0x338] sm:$0xff] }
  0x45   :  { %937 = vst [vmem:[%s2025_s1 + $0x2e8] sm:$0xff] %v936_v5  ;;  %v942_v8 = vld [vmem:[%s2024_s0 + $0x108] sm:$0xff]  ;;  %941 = vst [vmem:[%s2025_s1 + $0x358] sm:$0xff] %v940_v7  ;;  %v946_v10 = vld [vmem:[%s2024_s0 + $0x178] sm:$0xff] }
  0x46   :  { %v944_v9 = vld [vmem:[%s2024_s0 + $0x3a8] sm:$0xff]  ;;  %943 = vst [vmem:[%s2025_s1 + $0x128] sm:$0xff] %v942_v8  ;;  %v948_v11 = vld [vmem:[%s2024_s0 + $0x418] sm:$0xff]  ;;  %947 = vst [vmem:[%s2025_s1 + $0x198] sm:$0xff] %v946_v10 }
  0x47   :  { %945 = vst [vmem:[%s2025_s1 + $0x3c8] sm:$0xff] %v944_v9  ;;  %v950_v12 = vld [vmem:[%s2024_s0 + $0x1e8] sm:$0xff]  ;;  %949 = vst [vmem:[%s2025_s1 + $0x438] sm:$0xff] %v948_v11  ;;  %v954_v14 = vld [vmem:[%s2024_s0 + $0x258] sm:$0xff] }
  0x48   :  { %951 = vst [vmem:[%s2025_s1 + $0x208] sm:$0xff] %v950_v12  ;;  %v952_v13 = vld [vmem:[%s2024_s0 + $0x488] sm:$0xff]  ;;  %v956_v15 = vld [vmem:[%s2024_s0 + $0x4f8] sm:$0xff]  ;;  %955 = vst [vmem:[%s2025_s1 + $0x278] sm:$0xff] %v954_v14 }
  0x49   :  { %953 = vst [vmem:[%s2025_s1 + $0x4a8] sm:$0xff] %v952_v13  ;;  %957 = vst [vmem:[%s2025_s1 + $0x518] sm:$0xff] %v956_v15  ;;  %v958_v16 = vld [vmem:[%s2024_s0 + $0x18] sm:$0xff]  ;;  %v962_v18 = vld [vmem:[%s2024_s0 + $0x88] sm:$0xff] }
  0x4a   :  { %v960_v17 = vld [vmem:[%s2024_s0 + $0x2b8] sm:$0xff]  ;;  %959 = vst [vmem:[%s2025_s1 + $0x58] sm:$0xff] %v958_v16  ;;  %963 = vst [vmem:[%s2025_s1 + $0xc8] sm:$0xff] %v962_v18  ;;  %v964_v19 = vld [vmem:[%s2024_s0 + $0x328] sm:$0xff] }
  0x4b   :  { %961 = vst [vmem:[%s2025_s1 + $0x2f8] sm:$0xff] %v960_v17  ;;  %v966_v20 = vld [vmem:[%s2024_s0 + $0xf8] sm:$0xff]  ;;  %965 = vst [vmem:[%s2025_s1 + $0x368] sm:$0xff] %v964_v19  ;;  %v970_v22 = vld [vmem:[%s2024_s0 + $0x168] sm:$0xff] }
  0x4c   :  { %v968_v21 = vld [vmem:[%s2024_s0 + $0x398] sm:$0xff]  ;;  %967 = vst [vmem:[%s2025_s1 + $0x138] sm:$0xff] %v966_v20  ;;  %v972_v23 = vld [vmem:[%s2024_s0 + $0x408] sm:$0xff]  ;;  %971 = vst [vmem:[%s2025_s1 + $0x1a8] sm:$0xff] %v970_v22 }
  0x4d   :  { %969 = vst [vmem:[%s2025_s1 + $0x3d8] sm:$0xff] %v968_v21  ;;  %v974_v24 = vld [vmem:[%s2024_s0 + $0x1d8] sm:$0xff]  ;;  %973 = vst [vmem:[%s2025_s1 + $0x448] sm:$0xff] %v972_v23  ;;  %v978_v26 = vld [vmem:[%s2024_s0 + $0x248] sm:$0xff] }
  0x4e   :  { %975 = vst [vmem:[%s2025_s1 + $0x218] sm:$0xff] %v974_v24  ;;  %v976_v25 = vld [vmem:[%s2024_s0 + $0x478] sm:$0xff]  ;;  %v980_v27 = vld [vmem:[%s2024_s0 + $0x4e8] sm:$0xff]  ;;  %979 = vst [vmem:[%s2025_s1 + $0x288] sm:$0xff] %v978_v26 }
  0x4f   :  { %977 = vst [vmem:[%s2025_s1 + $0x4b8] sm:$0xff] %v976_v25  ;;  %981 = vst [vmem:[%s2025_s1 + $0x528] sm:$0xff] %v980_v27  ;;  %v982_v28 = vld [vmem:[%s2024_s0 + $0x8] sm:$0xff]  ;;  %v986_v30 = vld [vmem:[%s2024_s0 + $0x78] sm:$0xff] }
  0x50   :  { %v984_v29 = vld [vmem:[%s2024_s0 + $0x2a8] sm:$0xff]  ;;  %983 = vst [vmem:[%s2025_s1 + $0x68] sm:$0xff] %v982_v28  ;;  %987 = vst [vmem:[%s2025_s1 + $0xd8] sm:$0xff] %v986_v30  ;;  %v988_v31 = vld [vmem:[%s2024_s0 + $0x318] sm:$0xff] }
  0x51   :  { %985 = vst [vmem:[%s2025_s1 + $0x308] sm:$0xff] %v984_v29  ;;  %v990_v32 = vld [vmem:[%s2024_s0 + $0xe8] sm:$0xff]  ;;  %989 = vst [vmem:[%s2025_s1 + $0x378] sm:$0xff] %v988_v31  ;;  %v994_v34 = vld [vmem:[%s2024_s0 + $0x158] sm:$0xff] }
  0x52   :  { %v992_v33 = vld [vmem:[%s2024_s0 + $0x388] sm:$0xff]  ;;  %991 = vst [vmem:[%s2025_s1 + $0x148] sm:$0xff] %v990_v32  ;;  %v996_v35 = vld [vmem:[%s2024_s0 + $0x3f8] sm:$0xff]  ;;  %995 = vst [vmem:[%s2025_s1 + $0x1b8] sm:$0xff] %v994_v34 }
  0x53   :  { %993 = vst [vmem:[%s2025_s1 + $0x3e8] sm:$0xff] %v992_v33  ;;  %v998_v36 = vld [vmem:[%s2024_s0 + $0x1c8] sm:$0xff]  ;;  %997 = vst [vmem:[%s2025_s1 + $0x458] sm:$0xff] %v996_v35  ;;  %v1002_v38 = vld [vmem:[%s2024_s0 + $0x238] sm:$0xff] }
  0x54   :  { %999 = vst [vmem:[%s2025_s1 + $0x228] sm:$0xff] %v998_v36  ;;  %v1000_v37 = vld [vmem:[%s2024_s0 + $0x468] sm:$0xff]  ;;  %v1004_v39 = vld [vmem:[%s2024_s0 + $0x4d8] sm:$0xff]  ;;  %1003 = vst [vmem:[%s2025_s1 + $0x298] sm:$0xff] %v1002_v38 }
  0x55   :  { %1001 = vst [vmem:[%s2025_s1 + $0x4c8] sm:$0xff] %v1000_v37  ;;  %1005 = vst [vmem:[%s2025_s1 + $0x538] sm:$0xff] %v1004_v39 }

</bundles_post_ra>
